<compile_context>
chip_gen: v7x
topology: tpu7x:2x2x1
jax: 0.10.0
libtpu: 0.0.40
codegen_flags: <defaults>
</compile_context>

<pallas_src>
import functools

import jax
import jax.numpy as jnp
from jax.experimental import pallas as pl
from jax.experimental.pallas import tpu as pltpu

MXU_DTYPE = jnp.bfloat16   # matmul operand dtype; accumulation is always f32
BP = 8                     # batch rows padded to one (8, 128) sublane tile


# ---------------------------------------------------------------------------
# Fused kernel: embedding gather -> layer-0 bi-LSTM -> layer-1 bi-LSTM -> linear
# ---------------------------------------------------------------------------
def _fused_kernel(ids_ref, emb_ref, wih0_ref, whh0_ref, b0_ref,
                  wih1_ref, whh1_ref, b1_ref, fcw_ref, fcb_ref,
                  out_ref, pre_sc, x1_sc, *, T, Bp, H):
    H4 = 4 * H
    f32 = jnp.float32
    TBp = T * Bp
    V = emb_ref.shape[0]

    # ---- embedding gather (in-kernel, vectorized as a one-hot MXU matmul) ----
    # ids are already time-major + batch-padded; row r = t*Bp + b.
    # TODO(synk): for large vocabularies keep the table in HBM and DMA-gather rows
    # instead of a one-hot matmul (fine here: the V=50 row table lives in VMEM).
    onehot = (ids_ref[...] ==
              jax.lax.broadcasted_iota(jnp.int32, (TBp, V), 1)).astype(MXU_DTYPE)
    x = jnp.dot(onehot, emb_ref[...],
                preferred_element_type=f32).astype(MXU_DTYPE)          # (T*Bp, E)

    # `g`-gate lane mask (cell candidate uses tanh, i/f/o use sigmoid); hoisted.
    lane = jax.lax.broadcasted_iota(jnp.int32, (2 * Bp, H4), 1)
    g_mask = (lane >= 2 * H) & (lane < 3 * H)

    def run_layer(whh_ref, store_all):
        """Fwd+bwd recurrence over pre_sc (rows t*Bp..t*Bp+Bp, cols [fwd 4H|bwd 4H]).

        Both direction states are stacked: rows [:Bp] = forward, rows [Bp:] =
        backward, so each timestep needs exactly ONE recurrent MXU matmul.
        Returns the stacked final hidden state (2*Bp, H).
        """
        whh = whh_ref[...]                              # (H, 8H) = [W_hh_f | W_hh_b]
        h = jnp.zeros((2 * Bp, H), MXU_DTYPE)           # carried in bf16 (MXU operand)
        c = jnp.zeros((2 * Bp, H), f32)
        # TODO(synk): switch to lax.fori_loop if T grows beyond ~32; at T=8 a full
        # static unroll is cheapest and keeps the LLO scheduler happy.
        for t in range(T):                              # T static -> fully unrolled
            tb = T - 1 - t                              # backward walks T-1 .. 0
            rec = jnp.dot(h, whh, preferred_element_type=f32)          # (2Bp, 8H)
            gates = jnp.concatenate(
                [pre_sc[t * Bp:(t + 1) * Bp, :H4] + rec[:Bp, :H4],     # fwd @ t
                 pre_sc[tb * Bp:(tb + 1) * Bp, H4:] + rec[Bp:, H4:]],  # bwd @ tb
                axis=0)                                                # (2Bp, 4H)
            # Whole-vreg activations: one sigmoid + one tanh over all gates.
            act = jnp.where(g_mask, jnp.tanh(gates), jax.nn.sigmoid(gates))
            i = act[:, 0 * H:1 * H]
            f = act[:, 1 * H:2 * H]
            g = act[:, 2 * H:3 * H]
            o = act[:, 3 * H:4 * H]
            c = f * c + i * g
            h = (o * jnp.tanh(c)).astype(MXU_DTYPE)
            if store_all:                               # layer-0 output sequence (bf16)
                x1_sc[t * Bp:(t + 1) * Bp, :H] = h[:Bp]
                x1_sc[tb * Bp:(tb + 1) * Bp, H:] = h[Bp:]
        return h

    # ---------------- layer 0 ----------------
    # Hoisted input projection: all timesteps, both directions, one MXU matmul.
    pre_sc[...] = jnp.dot(x, wih0_ref[...], preferred_element_type=f32) + b0_ref[...]
    run_layer(whh0_ref, store_all=True)
    # TODO(synk): inter-layer LSTM dropout is training-only; identity in eval mode.

    # ---------------- layer 1 ----------------
    pre_sc[...] = (jnp.dot(x1_sc[...], wih1_ref[...],
                           preferred_element_type=f32) + b1_ref[...])
    h_fin = run_layer(whh1_ref, store_all=False)
    # h_fin[:Bp] == hidden[-2] (last-layer fwd final); h_fin[Bp:] == hidden[-1] (bwd)

    # ---------------- final linear (self.dropout = identity at inference) -----
    h_cat = jnp.concatenate([h_fin[:Bp], h_fin[Bp:]], axis=1)          # (Bp, 2H)
    out_ref[...] = (jnp.dot(h_cat, fcw_ref[...], preferred_element_type=f32)
                    + fcb_ref[...])                                    # (Bp, 128)


def _full_spec(shape):
    zeros = (0,) * len(shape)
    return pl.BlockSpec(shape, lambda: zeros)


# ---------------------------------------------------------------------------
# Forward pass matching MyModel.forward (eval mode)
# ---------------------------------------------------------------------------
@functools.partial(jax.jit, static_argnums=(2,))
def model_forward(tokens, params, out_dim):
    B, T = tokens.shape
    V, E = params["embedding"].shape
    H = params["whh_l0"].shape[0]
    OUT_PAD = params["fc_w"].shape[1]
    Bp = BP

    # Tiny int-only prep: time-major token ids, batch padded to Bp sublane rows.
    ids = jnp.zeros((T, Bp), jnp.int32).at[:, :B].set(tokens.T).reshape(T * Bp, 1)

    kernel = functools.partial(_fused_kernel, T=T, Bp=Bp, H=H)
    # TODO(synk): on v7x (2 TensorCores) split a large batch over a ("parallel",)
    # grid axis; with grid=() everything runs on one core.  For production T/B/H,
    # tile the projections over T and set pltpu.CompilerParams(vmem_limit_bytes=...)
    # before the resident scratch approaches v7x's 64 MiB VMEM.
    out_pad = pl.pallas_call(
        kernel,
        out_shape=jax.ShapeDtypeStruct((Bp, OUT_PAD), jnp.float32),
        in_specs=[
            _full_spec((T * Bp, 1)),        # token ids (time-major, batch-padded)
            _full_spec((V, E)),             # embedding table (bf16)
            _full_spec((E, 8 * H)),         # W_ih layer 0   [fwd 4H | bwd 4H]
            _full_spec((H, 8 * H)),         # W_hh layer 0   [fwd 4H | bwd 4H]
            _full_spec((1, 8 * H)),         # b_ih + b_hh layer 0
            _full_spec((2 * H, 8 * H)),     # W_ih layer 1
            _full_spec((H, 8 * H)),         # W_hh layer 1
            _full_spec((1, 8 * H)),         # bias layer 1
            _full_spec((2 * H, OUT_PAD)),   # fc weight (lane-padded to 128)
            _full_spec((1, OUT_PAD)),       # fc bias   (lane-padded to 128)
        ],
        out_specs=_full_spec((Bp, OUT_PAD)),
        scratch_shapes=[
            pltpu.VMEM((T * Bp, 8 * H), jnp.float32),    # pre-activations (reused per layer)
            pltpu.VMEM((T * Bp, 2 * H), jnp.bfloat16),   # layer-0 hidden sequence (layer-1 in)
        ],
    )(ids, params["embedding"],
      params["wih_l0"], params["whh_l0"], params["b_l0"],
      params["wih_l1"], params["whh_l1"], params["b_l1"],
      params["fc_w"], params["fc_b"])
    return out_pad[:B, :out_dim]


# ---------------------------------------------------------------------------
# Parameter construction (deterministic, PyTorch-like uniform init)
# ---------------------------------------------------------------------------
def init_params(key, vocab_size, embed_dim, hidden_dim, output_dim, pad_idx):
    H = hidden_dim
    OUT_PAD = 128                      # lane-dense final linear; sliced in wrapper
    keys = iter(jax.random.split(key, 32))

    def u(shape, bound):
        return jax.random.uniform(next(keys), shape, jnp.float32, -bound, bound)

    params = {}
    emb = jax.random.normal(next(keys), (vocab_size, embed_dim), jnp.float32)
    params["embedding"] = emb.at[pad_idx].set(0.0).astype(MXU_DTYPE)   # pad row = 0

    bound = hidden_dim ** -0.5
    # layer 0: input = embed_dim; layer 1: input = 2*H (bidirectional outputs)
    for l, din in ((0, embed_dim), (1, 2 * H)):
        wih_f = u((din, 4 * H), bound)
        wih_b = u((din, 4 * H), bound)
        whh_f = u((H, 4 * H), bound)
        whh_b = u((H, 4 * H), bound)
        params[f"wih_l{l}"] = jnp.concatenate([wih_f, wih_b], axis=1).astype(MXU_DTYPE)
        params[f"whh_l{l}"] = jnp.concatenate([whh_f, whh_b], axis=1).astype(MXU_DTYPE)
        b_f = u((4 * H,), bound) + u((4 * H,), bound)   # b_ih + b_hh (forward)
        b_b = u((4 * H,), bound) + u((4 * H,), bound)   # b_ih + b_hh (backward)
        params[f"b_l{l}"] = jnp.concatenate([b_f, b_b]).reshape(1, 8 * H)

    fb = (2 * H) ** -0.5
    fc_w = u((2 * H, output_dim), fb)
    fc_b = u((1, output_dim), fb)
    params["fc_w"] = jnp.pad(fc_w, ((0, 0), (0, OUT_PAD - output_dim))).astype(MXU_DTYPE)
    params["fc_b"] = jnp.pad(fc_b, ((0, 0), (0, OUT_PAD - output_dim)))
    return params


if __name__ == "__main__":
    VOCAB, EMBED, HIDDEN, OUT, PAD = 50, 32, 32, 4, 0
    B, T = 2, 8

    key = jax.random.PRNGKey(0)
    k_tok, k_par = jax.random.split(key)
    params = init_params(k_par, VOCAB, EMBED, HIDDEN, OUT, PAD)
    tokens = jax.random.randint(k_tok, (B, T), 0, VOCAB, dtype=jnp.int32)

    out = model_forward(tokens, params, OUT)
    jax.block_until_ready(out)
    assert out.shape == (B, OUT), out.shape
    print("KERNEL_OK")
</pallas_src>

<mosaic_0001>
module attributes {stable_mosaic.version = 11 : i64} {
  func.func @_fused_kernel(%arg0: memref<64x1xi32, #tpu.memory_space<vmem>>, %arg1: memref<50x32xbf16, #tpu.memory_space<vmem>>, %arg2: memref<32x256xbf16, #tpu.memory_space<vmem>>, %arg3: memref<32x256xbf16, #tpu.memory_space<vmem>>, %arg4: memref<1x256xf32, #tpu.memory_space<vmem>>, %arg5: memref<64x256xbf16, #tpu.memory_space<vmem>>, %arg6: memref<32x256xbf16, #tpu.memory_space<vmem>>, %arg7: memref<1x256xf32, #tpu.memory_space<vmem>>, %arg8: memref<64x128xbf16, #tpu.memory_space<vmem>>, %arg9: memref<1x128xf32, #tpu.memory_space<vmem>>, %arg10: memref<8x128xf32, #tpu.memory_space<vmem>>, %arg11: memref<64x256xf32, #tpu.memory_space<vmem>>, %arg12: memref<64x64xbf16, #tpu.memory_space<vmem>>) attributes {dimension_semantics = [], scalar_prefetch = 0 : i64, scratch_operands = 2 : i64, tpu.core_type = #tpu.core_type<tc>} {
    %c0 = arith.constant 0 : index
    %c0_0 = arith.constant 0 : index
    %0 = vector.load %arg0[%c0, %c0_0] : memref<64x1xi32, #tpu.memory_space<vmem>>, vector<64x1xi32>
    %1 = tpu.iota {dimensions = array<i32: 1>} : vector<64x50xi32>
    %2 = vector.broadcast %0 : vector<64x1xi32> to vector<64x50xi32>
    %3 = arith.cmpi eq, %2, %1 : vector<64x50xi32>
    %4 = arith.extui %3 : vector<64x50xi1> to vector<64x50xi32>
    %5 = arith.sitofp %4 : vector<64x50xi32> to vector<64x50xf32>
    %6 = arith.truncf %5 : vector<64x50xf32> to vector<64x50xbf16>
    %c0_1 = arith.constant 0 : index
    %c0_2 = arith.constant 0 : index
    %7 = vector.load %arg1[%c0_1, %c0_2] : memref<50x32xbf16, #tpu.memory_space<vmem>>, vector<50x32xbf16>
    %cst = arith.constant dense<0.000000e+00> : vector<64x32xf32>
    %8 = tpu.matmul %6, %7, %cst {dimension_numbers = #tpu.dot_dimension_numbers<[1], [0], [0], [1], [0, 0, 1, 1], [], []>} : vector<64x50xbf16>, vector<50x32xbf16>, vector<64x32xf32> -> vector<64x32xf32>
    %9 = arith.truncf %8 : vector<64x32xf32> to vector<64x32xbf16>
    %10 = tpu.iota {dimensions = array<i32: 1>} : vector<16x128xi32>
    %c64_i32 = arith.constant 64 : i32
    %11 = vector.broadcast %c64_i32 : i32 to vector<16x128xi32>
    %12 = arith.cmpi sge, %10, %11 : vector<16x128xi32>
    %c96_i32 = arith.constant 96 : i32
    %13 = vector.broadcast %c96_i32 : i32 to vector<16x128xi32>
    %14 = arith.cmpi slt, %10, %13 : vector<16x128xi32>
    %15 = arith.andi %12, %14 : vector<16x128xi1>
    %c0_3 = arith.constant 0 : index
    %c0_4 = arith.constant 0 : index
    %16 = vector.load %arg2[%c0_3, %c0_4] : memref<32x256xbf16, #tpu.memory_space<vmem>>, vector<32x256xbf16>
    %cst_5 = arith.constant dense<0.000000e+00> : vector<64x256xf32>
    %17 = tpu.matmul %9, %16, %cst_5 {dimension_numbers = #tpu.dot_dimension_numbers<[1], [0], [0], [1], [0, 0, 1, 1], [], []>} : vector<64x32xbf16>, vector<32x256xbf16>, vector<64x256xf32> -> vector<64x256xf32>
    %c0_6 = arith.constant 0 : index
    %c0_7 = arith.constant 0 : index
    %18 = vector.load %arg4[%c0_6, %c0_7] : memref<1x256xf32, #tpu.memory_space<vmem>>, vector<1x256xf32>
    %19 = vector.broadcast %18 : vector<1x256xf32> to vector<64x256xf32>
    %20 = arith.addf %17, %19 : vector<64x256xf32>
    %c0_8 = arith.constant 0 : index
    %c0_9 = arith.constant 0 : index
    %21 = vector.load %arg11[%c0_8, %c0_9] : memref<64x256xf32, #tpu.memory_space<vmem>>, vector<64x256xf32>
    tpu.vector_store %arg11[%c0_8, %c0_9], %20 {strides = array<i32>} : memref<64x256xf32, #tpu.memory_space<vmem>>, vector<64x256xf32>,
    %c0_10 = arith.constant 0 : index
    %c0_11 = arith.constant 0 : index
    %22 = vector.load %arg3[%c0_10, %c0_11] : memref<32x256xbf16, #tpu.memory_space<vmem>>, vector<32x256xbf16>
    %cst_12 = arith.constant 0.000000e+00 : bf16
    %23 = vector.broadcast %cst_12 : bf16 to vector<16x32xbf16>
    %cst_13 = arith.constant 0.000000e+00 : f32
    %24 = vector.broadcast %cst_13 : f32 to vector<16x32xf32>
    %cst_14 = arith.constant dense<0.000000e+00> : vector<16x256xf32>
    %25 = tpu.matmul %23, %22, %cst_14 {dimension_numbers = #tpu.dot_dimension_numbers<[1], [0], [0], [1], [0, 0, 1, 1], [], []>} : vector<16x32xbf16>, vector<32x256xbf16>, vector<16x256xf32> -> vector<16x256xf32>
    %c0_15 = arith.constant 0 : index
    %c0_16 = arith.constant 0 : index
    %26 = vector.load %arg11[%c0_15, %c0_16] : memref<64x256xf32, #tpu.memory_space<vmem>>, vector<8x128xf32>
    %27 = vector.extract_strided_slice %25 {offsets = [0, 0], sizes = [8, 128], strides = [1, 1]} : vector<16x256xf32> to vector<8x128xf32>
    %28 = arith.addf %26, %27 : vector<8x128xf32>
    %c56 = arith.constant 56 : index
    %c128 = arith.constant 128 : index
    %29 = vector.load %arg11[%c56, %c128] : memref<64x256xf32, #tpu.memory_space<vmem>>, vector<8x128xf32>
    %30 = vector.extract_strided_slice %25 {offsets = [8, 128], sizes = [8, 128], strides = [1, 1]} : vector<16x256xf32> to vector<8x128xf32>
    %31 = arith.addf %29, %30 : vector<8x128xf32>
    %32 = tpu.concatenate %28, %31 in 0 : vector<8x128xf32>, vector<8x128xf32> -> vector<16x128xf32>
    %33 = math.tanh %32 : vector<16x128xf32>
    %34 = arith.negf %32 : vector<16x128xf32>
    %35 = math.exp %34 : vector<16x128xf32>
    %cst_17 = arith.constant 1.000000e+00 : f32
    %36 = vector.broadcast %cst_17 : f32 to vector<16x128xf32>
    %37 = arith.addf %36, %35 : vector<16x128xf32>
    %38 = arith.divf %36, %37 : vector<16x128xf32>
    %39 = arith.select %15, %33, %38 : vector<16x128xi1>, vector<16x128xf32>
    %40 = vector.extract_strided_slice %39 {offsets = [0, 0], sizes = [16, 32], strides = [1, 1]} : vector<16x128xf32> to vector<16x32xf32>
    %41 = vector.extract_strided_slice %39 {offsets = [0, 32], sizes = [16, 32], strides = [1, 1]} : vector<16x128xf32> to vector<16x32xf32>
    %42 = vector.extract_strided_slice %39 {offsets = [0, 64], sizes = [16, 32], strides = [1, 1]} : vector<16x128xf32> to vector<16x32xf32>
    %43 = vector.extract_strided_slice %39 {offsets = [0, 96], sizes = [16, 32], strides = [1, 1]} : vector<16x128xf32> to vector<16x32xf32>
    %44 = arith.mulf %41, %24 : vector<16x32xf32>
    %45 = arith.mulf %40, %42 : vector<16x32xf32>
    %46 = arith.addf %44, %45 : vector<16x32xf32>
    %47 = math.tanh %46 : vector<16x32xf32>
    %48 = arith.mulf %43, %47 : vector<16x32xf32>
    %49 = arith.truncf %48 : vector<16x32xf32> to vector<16x32xbf16>
    %50 = vector.extract_strided_slice %49 {offsets = [0, 0], sizes = [8, 32], strides = [1, 1]} : vector<16x32xbf16> to vector<8x32xbf16>
    %c0_18 = arith.constant 0 : index
    %c0_19 = arith.constant 0 : index
    %51 = vector.load %arg12[%c0_18, %c0_19] : memref<64x64xbf16, #tpu.memory_space<vmem>>, vector<8x32xbf16>
    tpu.vector_store %arg12[%c0_18, %c0_19], %50 {strides = array<i32>} : memref<64x64xbf16, #tpu.memory_space<vmem>>, vector<8x32xbf16>,
    %52 = vector.extract_strided_slice %49 {offsets = [8, 0], sizes = [8, 32], strides = [1, 1]} : vector<16x32xbf16> to vector<8x32xbf16>
    %c56_20 = arith.constant 56 : index
    %c32 = arith.constant 32 : index
    %53 = vector.load %arg12[%c56_20, %c32] : memref<64x64xbf16, #tpu.memory_space<vmem>>, vector<8x32xbf16>
    tpu.vector_store %arg12[%c56_20, %c32], %52 {strides = array<i32>} : memref<64x64xbf16, #tpu.memory_space<vmem>>, vector<8x32xbf16>,
    %cst_21 = arith.constant dense<0.000000e+00> : vector<16x256xf32>
    %54 = tpu.matmul %49, %22, %cst_21 {dimension_numbers = #tpu.dot_dimension_numbers<[1], [0], [0], [1], [0, 0, 1, 1], [], []>} : vector<16x32xbf16>, vector<32x256xbf16>, vector<16x256xf32> -> vector<16x256xf32>
    %c8 = arith.constant 8 : index
    %c0_22 = arith.constant 0 : index
    %55 = vector.load %arg11[%c8, %c0_22] : memref<64x256xf32, #tpu.memory_space<vmem>>, vector<8x128xf32>
    %56 = vector.extract_strided_slice %54 {offsets = [0, 0], sizes = [8, 128], strides = [1, 1]} : vector<16x256xf32> to vector<8x128xf32>
    %57 = arith.addf %55, %56 : vector<8x128xf32>
    %c48 = arith.constant 48 : index
    %c128_23 = arith.constant 128 : index
    %58 = vector.load %arg11[%c48, %c128_23] : memref<64x256xf32, #tpu.memory_space<vmem>>, vector<8x128xf32>
    %59 = vector.extract_strided_slice %54 {offsets = [8, 128], sizes = [8, 128], strides = [1, 1]} : vector<16x256xf32> to vector<8x128xf32>
    %60 = arith.addf %58, %59 : vector<8x128xf32>
    %61 = tpu.concatenate %57, %60 in 0 : vector<8x128xf32>, vector<8x128xf32> -> vector<16x128xf32>
    %62 = math.tanh %61 : vector<16x128xf32>
    %63 = arith.negf %61 : vector<16x128xf32>
    %64 = math.exp %63 : vector<16x128xf32>
    %cst_24 = arith.constant 1.000000e+00 : f32
    %65 = vector.broadcast %cst_24 : f32 to vector<16x128xf32>
    %66 = arith.addf %65, %64 : vector<16x128xf32>
    %67 = arith.divf %65, %66 : vector<16x128xf32>
    %68 = arith.select %15, %62, %67 : vector<16x128xi1>, vector<16x128xf32>
    %69 = vector.extract_strided_slice %68 {offsets = [0, 0], sizes = [16, 32], strides = [1, 1]} : vector<16x128xf32> to vector<16x32xf32>
    %70 = vector.extract_strided_slice %68 {offsets = [0, 32], sizes = [16, 32], strides = [1, 1]} : vector<16x128xf32> to vector<16x32xf32>
    %71 = vector.extract_strided_slice %68 {offsets = [0, 64], sizes = [16, 32], strides = [1, 1]} : vector<16x128xf32> to vector<16x32xf32>
    %72 = vector.extract_strided_slice %68 {offsets = [0, 96], sizes = [16, 32], strides = [1, 1]} : vector<16x128xf32> to vector<16x32xf32>
    %73 = arith.mulf %70, %46 : vector<16x32xf32>
    %74 = arith.mulf %69, %71 : vector<16x32xf32>
    %75 = arith.addf %73, %74 : vector<16x32xf32>
    %76 = math.tanh %75 : vector<16x32xf32>
    %77 = arith.mulf %72, %76 : vector<16x32xf32>
    %78 = arith.truncf %77 : vector<16x32xf32> to vector<16x32xbf16>
    %79 = vector.extract_strided_slice %78 {offsets = [0, 0], sizes = [8, 32], strides = [1, 1]} : vector<16x32xbf16> to vector<8x32xbf16>
    %c8_25 = arith.constant 8 : index
    %c0_26 = arith.constant 0 : index
    %80 = vector.load %arg12[%c8_25, %c0_26] : memref<64x64xbf16, #tpu.memory_space<vmem>>, vector<8x32xbf16>
    tpu.vector_store %arg12[%c8_25, %c0_26], %79 {strides = array<i32>} : memref<64x64xbf16, #tpu.memory_space<vmem>>, vector<8x32xbf16>,
    %81 = vector.extract_strided_slice %78 {offsets = [8, 0], sizes = [8, 32], strides = [1, 1]} : vector<16x32xbf16> to vector<8x32xbf16>
    %c48_27 = arith.constant 48 : index
    %c32_28 = arith.constant 32 : index
    %82 = vector.load %arg12[%c48_27, %c32_28] : memref<64x64xbf16, #tpu.memory_space<vmem>>, vector<8x32xbf16>
    tpu.vector_store %arg12[%c48_27, %c32_28], %81 {strides = array<i32>} : memref<64x64xbf16, #tpu.memory_space<vmem>>, vector<8x32xbf16>,
    %cst_29 = arith.constant dense<0.000000e+00> : vector<16x256xf32>
    %83 = tpu.matmul %78, %22, %cst_29 {dimension_numbers = #tpu.dot_dimension_numbers<[1], [0], [0], [1], [0, 0, 1, 1], [], []>} : vector<16x32xbf16>, vector<32x256xbf16>, vector<16x256xf32> -> vector<16x256xf32>
    %c16 = arith.constant 16 : index
    %c0_30 = arith.constant 0 : index
    %84 = vector.load %arg11[%c16, %c0_30] : memref<64x256xf32, #tpu.memory_space<vmem>>, vector<8x128xf32>
    %85 = vector.extract_strided_slice %83 {offsets = [0, 0], sizes = [8, 128], strides = [1, 1]} : vector<16x256xf32> to vector<8x128xf32>
    %86 = arith.addf %84, %85 : vector<8x128xf32>
    %c40 = arith.constant 40 : index
    %c128_31 = arith.constant 128 : index
    %87 = vector.load %arg11[%c40, %c128_31] : memref<64x256xf32, #tpu.memory_space<vmem>>, vector<8x128xf32>
    %88 = vector.extract_strided_slice %83 {offsets = [8, 128], sizes = [8, 128], strides = [1, 1]} : vector<16x256xf32> to vector<8x128xf32>
    %89 = arith.addf %87, %88 : vector<8x128xf32>
    %90 = tpu.concatenate %86, %89 in 0 : vector<8x128xf32>, vector<8x128xf32> -> vector<16x128xf32>
    %91 = math.tanh %90 : vector<16x128xf32>
    %92 = arith.negf %90 : vector<16x128xf32>
    %93 = math.exp %92 : vector<16x128xf32>
    %cst_32 = arith.constant 1.000000e+00 : f32
    %94 = vector.broadcast %cst_32 : f32 to vector<16x128xf32>
    %95 = arith.addf %94, %93 : vector<16x128xf32>
    %96 = arith.divf %94, %95 : vector<16x128xf32>
    %97 = arith.select %15, %91, %96 : vector<16x128xi1>, vector<16x128xf32>
    %98 = vector.extract_strided_slice %97 {offsets = [0, 0], sizes = [16, 32], strides = [1, 1]} : vector<16x128xf32> to vector<16x32xf32>
    %99 = vector.extract_strided_slice %97 {offsets = [0, 32], sizes = [16, 32], strides = [1, 1]} : vector<16x128xf32> to vector<16x32xf32>
    %100 = vector.extract_strided_slice %97 {offsets = [0, 64], sizes = [16, 32], strides = [1, 1]} : vector<16x128xf32> to vector<16x32xf32>
    %101 = vector.extract_strided_slice %97 {offsets = [0, 96], sizes = [16, 32], strides = [1, 1]} : vector<16x128xf32> to vector<16x32xf32>
    %102 = arith.mulf %99, %75 : vector<16x32xf32>
    %103 = arith.mulf %98, %100 : vector<16x32xf32>
    %104 = arith.addf %102, %103 : vector<16x32xf32>
    %105 = math.tanh %104 : vector<16x32xf32>
    %106 = arith.mulf %101, %105 : vector<16x32xf32>
    %107 = arith.truncf %106 : vector<16x32xf32> to vector<16x32xbf16>
    %108 = vector.extract_strided_slice %107 {offsets = [0, 0], sizes = [8, 32], strides = [1, 1]} : vector<16x32xbf16> to vector<8x32xbf16>
    %c16_33 = arith.constant 16 : index
    %c0_34 = arith.constant 0 : index
    %109 = vector.load %arg12[%c16_33, %c0_34] : memref<64x64xbf16, #tpu.memory_space<vmem>>, vector<8x32xbf16>
    tpu.vector_store %arg12[%c16_33, %c0_34], %108 {strides = array<i32>} : memref<64x64xbf16, #tpu.memory_space<vmem>>, vector<8x32xbf16>,
    %110 = vector.extract_strided_slice %107 {offsets = [8, 0], sizes = [8, 32], strides = [1, 1]} : vector<16x32xbf16> to vector<8x32xbf16>
    %c40_35 = arith.constant 40 : index
    %c32_36 = arith.constant 32 : index
    %111 = vector.load %arg12[%c40_35, %c32_36] : memref<64x64xbf16, #tpu.memory_space<vmem>>, vector<8x32xbf16>
    tpu.vector_store %arg12[%c40_35, %c32_36], %110 {strides = array<i32>} : memref<64x64xbf16, #tpu.memory_space<vmem>>, vector<8x32xbf16>,
    %cst_37 = arith.constant dense<0.000000e+00> : vector<16x256xf32>
    %112 = tpu.matmul %107, %22, %cst_37 {dimension_numbers = #tpu.dot_dimension_numbers<[1], [0], [0], [1], [0, 0, 1, 1], [], []>} : vector<16x32xbf16>, vector<32x256xbf16>, vector<16x256xf32> -> vector<16x256xf32>
    %c24 = arith.constant 24 : index
    %c0_38 = arith.constant 0 : index
    %113 = vector.load %arg11[%c24, %c0_38] : memref<64x256xf32, #tpu.memory_space<vmem>>, vector<8x128xf32>
    %114 = vector.extract_strided_slice %112 {offsets = [0, 0], sizes = [8, 128], strides = [1, 1]} : vector<16x256xf32> to vector<8x128xf32>
    %115 = arith.addf %113, %114 : vector<8x128xf32>
    %c32_39 = arith.constant 32 : index
    %c128_40 = arith.constant 128 : index
    %116 = vector.load %arg11[%c32_39, %c128_40] : memref<64x256xf32, #tpu.memory_space<vmem>>, vector<8x128xf32>
    %117 = vector.extract_strided_slice %112 {offsets = [8, 128], sizes = [8, 128], strides = [1, 1]} : vector<16x256xf32> to vector<8x128xf32>
    %118 = arith.addf %116, %117 : vector<8x128xf32>
    %119 = tpu.concatenate %115, %118 in 0 : vector<8x128xf32>, vector<8x128xf32> -> vector<16x128xf32>
    %120 = math.tanh %119 : vector<16x128xf32>
    %121 = arith.negf %119 : vector<16x128xf32>
    %122 = math.exp %121 : vector<16x128xf32>
    %cst_41 = arith.constant 1.000000e+00 : f32
    %123 = vector.broadcast %cst_41 : f32 to vector<16x128xf32>
    %124 = arith.addf %123, %122 : vector<16x128xf32>
    %125 = arith.divf %123, %124 : vector<16x128xf32>
    %126 = arith.select %15, %120, %125 : vector<16x128xi1>, vector<16x128xf32>
    %127 = vector.extract_strided_slice %126 {offsets = [0, 0], sizes = [16, 32], strides = [1, 1]} : vector<16x128xf32> to vector<16x32xf32>
    %128 = vector.extract_strided_slice %126 {offsets = [0, 32], sizes = [16, 32], strides = [1, 1]} : vector<16x128xf32> to vector<16x32xf32>
    %129 = vector.extract_strided_slice %126 {offsets = [0, 64], sizes = [16, 32], strides = [1, 1]} : vector<16x128xf32> to vector<16x32xf32>
    %130 = vector.extract_strided_slice %126 {offsets = [0, 96], sizes = [16, 32], strides = [1, 1]} : vector<16x128xf32> to vector<16x32xf32>
    %131 = arith.mulf %128, %104 : vector<16x32xf32>
    %132 = arith.mulf %127, %129 : vector<16x32xf32>
    %133 = arith.addf %131, %132 : vector<16x32xf32>
    %134 = math.tanh %133 : vector<16x32xf32>
    %135 = arith.mulf %130, %134 : vector<16x32xf32>
    %136 = arith.truncf %135 : vector<16x32xf32> to vector<16x32xbf16>
    %137 = vector.extract_strided_slice %136 {offsets = [0, 0], sizes = [8, 32], strides = [1, 1]} : vector<16x32xbf16> to vector<8x32xbf16>
    %c24_42 = arith.constant 24 : index
    %c0_43 = arith.constant 0 : index
    %138 = vector.load %arg12[%c24_42, %c0_43] : memref<64x64xbf16, #tpu.memory_space<vmem>>, vector<8x32xbf16>
    tpu.vector_store %arg12[%c24_42, %c0_43], %137 {strides = array<i32>} : memref<64x64xbf16, #tpu.memory_space<vmem>>, vector<8x32xbf16>,
    %139 = vector.extract_strided_slice %136 {offsets = [8, 0], sizes = [8, 32], strides = [1, 1]} : vector<16x32xbf16> to vector<8x32xbf16>
    %c32_44 = arith.constant 32 : index
    %c32_45 = arith.constant 32 : index
    %140 = vector.load %arg12[%c32_44, %c32_45] : memref<64x64xbf16, #tpu.memory_space<vmem>>, vector<8x32xbf16>
    tpu.vector_store %arg12[%c32_44, %c32_45], %139 {strides = array<i32>} : memref<64x64xbf16, #tpu.memory_space<vmem>>, vector<8x32xbf16>,
    %cst_46 = arith.constant dense<0.000000e+00> : vector<16x256xf32>
    %141 = tpu.matmul %136, %22, %cst_46 {dimension_numbers = #tpu.dot_dimension_numbers<[1], [0], [0], [1], [0, 0, 1, 1], [], []>} : vector<16x32xbf16>, vector<32x256xbf16>, vector<16x256xf32> -> vector<16x256xf32>
    %c32_47 = arith.constant 32 : index
    %c0_48 = arith.constant 0 : index
    %142 = vector.load %arg11[%c32_47, %c0_48] : memref<64x256xf32, #tpu.memory_space<vmem>>, vector<8x128xf32>
    %143 = vector.extract_strided_slice %141 {offsets = [0, 0], sizes = [8, 128], strides = [1, 1]} : vector<16x256xf32> to vector<8x128xf32>
    %144 = arith.addf %142, %143 : vector<8x128xf32>
    %c24_49 = arith.constant 24 : index
    %c128_50 = arith.constant 128 : index
    %145 = vector.load %arg11[%c24_49, %c128_50] : memref<64x256xf32, #tpu.memory_space<vmem>>, vector<8x128xf32>
    %146 = vector.extract_strided_slice %141 {offsets = [8, 128], sizes = [8, 128], strides = [1, 1]} : vector<16x256xf32> to vector<8x128xf32>
    %147 = arith.addf %145, %146 : vector<8x128xf32>
    %148 = tpu.concatenate %144, %147 in 0 : vector<8x128xf32>, vector<8x128xf32> -> vector<16x128xf32>
    %149 = math.tanh %148 : vector<16x128xf32>
    %150 = arith.negf %148 : vector<16x128xf32>
    %151 = math.exp %150 : vector<16x128xf32>
    %cst_51 = arith.constant 1.000000e+00 : f32
    %152 = vector.broadcast %cst_51 : f32 to vector<16x128xf32>
    %153 = arith.addf %152, %151 : vector<16x128xf32>
    %154 = arith.divf %152, %153 : vector<16x128xf32>
    %155 = arith.select %15, %149, %154 : vector<16x128xi1>, vector<16x128xf32>
    %156 = vector.extract_strided_slice %155 {offsets = [0, 0], sizes = [16, 32], strides = [1, 1]} : vector<16x128xf32> to vector<16x32xf32>
    %157 = vector.extract_strided_slice %155 {offsets = [0, 32], sizes = [16, 32], strides = [1, 1]} : vector<16x128xf32> to vector<16x32xf32>
    %158 = vector.extract_strided_slice %155 {offsets = [0, 64], sizes = [16, 32], strides = [1, 1]} : vector<16x128xf32> to vector<16x32xf32>
    %159 = vector.extract_strided_slice %155 {offsets = [0, 96], sizes = [16, 32], strides = [1, 1]} : vector<16x128xf32> to vector<16x32xf32>
    %160 = arith.mulf %157, %133 : vector<16x32xf32>
    %161 = arith.mulf %156, %158 : vector<16x32xf32>
    %162 = arith.addf %160, %161 : vector<16x32xf32>
    %163 = math.tanh %162 : vector<16x32xf32>
    %164 = arith.mulf %159, %163 : vector<16x32xf32>
    %165 = arith.truncf %164 : vector<16x32xf32> to vector<16x32xbf16>
    %166 = vector.extract_strided_slice %165 {offsets = [0, 0], sizes = [8, 32], strides = [1, 1]} : vector<16x32xbf16> to vector<8x32xbf16>
    %c32_52 = arith.constant 32 : index
    %c0_53 = arith.constant 0 : index
    %167 = vector.load %arg12[%c32_52, %c0_53] : memref<64x64xbf16, #tpu.memory_space<vmem>>, vector<8x32xbf16>
    tpu.vector_store %arg12[%c32_52, %c0_53], %166 {strides = array<i32>} : memref<64x64xbf16, #tpu.memory_space<vmem>>, vector<8x32xbf16>,
    %168 = vector.extract_strided_slice %165 {offsets = [8, 0], sizes = [8, 32], strides = [1, 1]} : vector<16x32xbf16> to vector<8x32xbf16>
    %c24_54 = arith.constant 24 : index
    %c32_55 = arith.constant 32 : index
    %169 = vector.load %arg12[%c24_54, %c32_55] : memref<64x64xbf16, #tpu.memory_space<vmem>>, vector<8x32xbf16>
    tpu.vector_store %arg12[%c24_54, %c32_55], %168 {strides = array<i32>} : memref<64x64xbf16, #tpu.memory_space<vmem>>, vector<8x32xbf16>,
    %cst_56 = arith.constant dense<0.000000e+00> : vector<16x256xf32>
    %170 = tpu.matmul %165, %22, %cst_56 {dimension_numbers = #tpu.dot_dimension_numbers<[1], [0], [0], [1], [0, 0, 1, 1], [], []>} : vector<16x32xbf16>, vector<32x256xbf16>, vector<16x256xf32> -> vector<16x256xf32>
    %c40_57 = arith.constant 40 : index
    %c0_58 = arith.constant 0 : index
    %171 = vector.load %arg11[%c40_57, %c0_58] : memref<64x256xf32, #tpu.memory_space<vmem>>, vector<8x128xf32>
    %172 = vector.extract_strided_slice %170 {offsets = [0, 0], sizes = [8, 128], strides = [1, 1]} : vector<16x256xf32> to vector<8x128xf32>
    %173 = arith.addf %171, %172 : vector<8x128xf32>
    %c16_59 = arith.constant 16 : index
    %c128_60 = arith.constant 128 : index
    %174 = vector.load %arg11[%c16_59, %c128_60] : memref<64x256xf32, #tpu.memory_space<vmem>>, vector<8x128xf32>
    %175 = vector.extract_strided_slice %170 {offsets = [8, 128], sizes = [8, 128], strides = [1, 1]} : vector<16x256xf32> to vector<8x128xf32>
    %176 = arith.addf %174, %175 : vector<8x128xf32>
    %177 = tpu.concatenate %173, %176 in 0 : vector<8x128xf32>, vector<8x128xf32> -> vector<16x128xf32>
    %178 = math.tanh %177 : vector<16x128xf32>
    %179 = arith.negf %177 : vector<16x128xf32>
    %180 = math.exp %179 : vector<16x128xf32>
    %cst_61 = arith.constant 1.000000e+00 : f32
    %181 = vector.broadcast %cst_61 : f32 to vector<16x128xf32>
    %182 = arith.addf %181, %180 : vector<16x128xf32>
    %183 = arith.divf %181, %182 : vector<16x128xf32>
    %184 = arith.select %15, %178, %183 : vector<16x128xi1>, vector<16x128xf32>
    %185 = vector.extract_strided_slice %184 {offsets = [0, 0], sizes = [16, 32], strides = [1, 1]} : vector<16x128xf32> to vector<16x32xf32>
    %186 = vector.extract_strided_slice %184 {offsets = [0, 32], sizes = [16, 32], strides = [1, 1]} : vector<16x128xf32> to vector<16x32xf32>
    %187 = vector.extract_strided_slice %184 {offsets = [0, 64], sizes = [16, 32], strides = [1, 1]} : vector<16x128xf32> to vector<16x32xf32>
    %188 = vector.extract_strided_slice %184 {offsets = [0, 96], sizes = [16, 32], strides = [1, 1]} : vector<16x128xf32> to vector<16x32xf32>
    %189 = arith.mulf %186, %162 : vector<16x32xf32>
    %190 = arith.mulf %185, %187 : vector<16x32xf32>
    %191 = arith.addf %189, %190 : vector<16x32xf32>
    %192 = math.tanh %191 : vector<16x32xf32>
    %193 = arith.mulf %188, %192 : vector<16x32xf32>
    %194 = arith.truncf %193 : vector<16x32xf32> to vector<16x32xbf16>
    %195 = vector.extract_strided_slice %194 {offsets = [0, 0], sizes = [8, 32], strides = [1, 1]} : vector<16x32xbf16> to vector<8x32xbf16>
    %c40_62 = arith.constant 40 : index
    %c0_63 = arith.constant 0 : index
    %196 = vector.load %arg12[%c40_62, %c0_63] : memref<64x64xbf16, #tpu.memory_space<vmem>>, vector<8x32xbf16>
    tpu.vector_store %arg12[%c40_62, %c0_63], %195 {strides = array<i32>} : memref<64x64xbf16, #tpu.memory_space<vmem>>, vector<8x32xbf16>,
    %197 = vector.extract_strided_slice %194 {offsets = [8, 0], sizes = [8, 32], strides = [1, 1]} : vector<16x32xbf16> to vector<8x32xbf16>
    %c16_64 = arith.constant 16 : index
    %c32_65 = arith.constant 32 : index
    %198 = vector.load %arg12[%c16_64, %c32_65] : memref<64x64xbf16, #tpu.memory_space<vmem>>, vector<8x32xbf16>
    tpu.vector_store %arg12[%c16_64, %c32_65], %197 {strides = array<i32>} : memref<64x64xbf16, #tpu.memory_space<vmem>>, vector<8x32xbf16>,
    %cst_66 = arith.constant dense<0.000000e+00> : vector<16x256xf32>
    %199 = tpu.matmul %194, %22, %cst_66 {dimension_numbers = #tpu.dot_dimension_numbers<[1], [0], [0], [1], [0, 0, 1, 1], [], []>} : vector<16x32xbf16>, vector<32x256xbf16>, vector<16x256xf32> -> vector<16x256xf32>
    %c48_67 = arith.constant 48 : index
    %c0_68 = arith.constant 0 : index
    %200 = vector.load %arg11[%c48_67, %c0_68] : memref<64x256xf32, #tpu.memory_space<vmem>>, vector<8x128xf32>
    %201 = vector.extract_strided_slice %199 {offsets = [0, 0], sizes = [8, 128], strides = [1, 1]} : vector<16x256xf32> to vector<8x128xf32>
    %202 = arith.addf %200, %201 : vector<8x128xf32>
    %c8_69 = arith.constant 8 : index
    %c128_70 = arith.constant 128 : index
    %203 = vector.load %arg11[%c8_69, %c128_70] : memref<64x256xf32, #tpu.memory_space<vmem>>, vector<8x128xf32>
    %204 = vector.extract_strided_slice %199 {offsets = [8, 128], sizes = [8, 128], strides = [1, 1]} : vector<16x256xf32> to vector<8x128xf32>
    %205 = arith.addf %203, %204 : vector<8x128xf32>
    %206 = tpu.concatenate %202, %205 in 0 : vector<8x128xf32>, vector<8x128xf32> -> vector<16x128xf32>
    %207 = math.tanh %206 : vector<16x128xf32>
    %208 = arith.negf %206 : vector<16x128xf32>
    %209 = math.exp %208 : vector<16x128xf32>
    %cst_71 = arith.constant 1.000000e+00 : f32
    %210 = vector.broadcast %cst_71 : f32 to vector<16x128xf32>
    %211 = arith.addf %210, %209 : vector<16x128xf32>
    %212 = arith.divf %210, %211 : vector<16x128xf32>
    %213 = arith.select %15, %207, %212 : vector<16x128xi1>, vector<16x128xf32>
    %214 = vector.extract_strided_slice %213 {offsets = [0, 0], sizes = [16, 32], strides = [1, 1]} : vector<16x128xf32> to vector<16x32xf32>
    %215 = vector.extract_strided_slice %213 {offsets = [0, 32], sizes = [16, 32], strides = [1, 1]} : vector<16x128xf32> to vector<16x32xf32>
    %216 = vector.extract_strided_slice %213 {offsets = [0, 64], sizes = [16, 32], strides = [1, 1]} : vector<16x128xf32> to vector<16x32xf32>
    %217 = vector.extract_strided_slice %213 {offsets = [0, 96], sizes = [16, 32], strides = [1, 1]} : vector<16x128xf32> to vector<16x32xf32>
    %218 = arith.mulf %215, %191 : vector<16x32xf32>
    %219 = arith.mulf %214, %216 : vector<16x32xf32>
    %220 = arith.addf %218, %219 : vector<16x32xf32>
    %221 = math.tanh %220 : vector<16x32xf32>
    %222 = arith.mulf %217, %221 : vector<16x32xf32>
    %223 = arith.truncf %222 : vector<16x32xf32> to vector<16x32xbf16>
    %224 = vector.extract_strided_slice %223 {offsets = [0, 0], sizes = [8, 32], strides = [1, 1]} : vector<16x32xbf16> to vector<8x32xbf16>
    %c48_72 = arith.constant 48 : index
    %c0_73 = arith.constant 0 : index
    %225 = vector.load %arg12[%c48_72, %c0_73] : memref<64x64xbf16, #tpu.memory_space<vmem>>, vector<8x32xbf16>
    tpu.vector_store %arg12[%c48_72, %c0_73], %224 {strides = array<i32>} : memref<64x64xbf16, #tpu.memory_space<vmem>>, vector<8x32xbf16>,
    %226 = vector.extract_strided_slice %223 {offsets = [8, 0], sizes = [8, 32], strides = [1, 1]} : vector<16x32xbf16> to vector<8x32xbf16>
    %c8_74 = arith.constant 8 : index
    %c32_75 = arith.constant 32 : index
    %227 = vector.load %arg12[%c8_74, %c32_75] : memref<64x64xbf16, #tpu.memory_space<vmem>>, vector<8x32xbf16>
    tpu.vector_store %arg12[%c8_74, %c32_75], %226 {strides = array<i32>} : memref<64x64xbf16, #tpu.memory_space<vmem>>, vector<8x32xbf16>,
    %cst_76 = arith.constant dense<0.000000e+00> : vector<16x256xf32>
    %228 = tpu.matmul %223, %22, %cst_76 {dimension_numbers = #tpu.dot_dimension_numbers<[1], [0], [0], [1], [0, 0, 1, 1], [], []>} : vector<16x32xbf16>, vector<32x256xbf16>, vector<16x256xf32> -> vector<16x256xf32>
    %c56_77 = arith.constant 56 : index
    %c0_78 = arith.constant 0 : index
    %229 = vector.load %arg11[%c56_77, %c0_78] : memref<64x256xf32, #tpu.memory_space<vmem>>, vector<8x128xf32>
    %230 = vector.extract_strided_slice %228 {offsets = [0, 0], sizes = [8, 128], strides = [1, 1]} : vector<16x256xf32> to vector<8x128xf32>
    %231 = arith.addf %229, %230 : vector<8x128xf32>
    %c0_79 = arith.constant 0 : index
    %c128_80 = arith.constant 128 : index
    %232 = vector.load %arg11[%c0_79, %c128_80] : memref<64x256xf32, #tpu.memory_space<vmem>>, vector<8x128xf32>
    %233 = vector.extract_strided_slice %228 {offsets = [8, 128], sizes = [8, 128], strides = [1, 1]} : vector<16x256xf32> to vector<8x128xf32>
    %234 = arith.addf %232, %233 : vector<8x128xf32>
    %235 = tpu.concatenate %231, %234 in 0 : vector<8x128xf32>, vector<8x128xf32> -> vector<16x128xf32>
    %236 = math.tanh %235 : vector<16x128xf32>
    %237 = arith.negf %235 : vector<16x128xf32>
    %238 = math.exp %237 : vector<16x128xf32>
    %cst_81 = arith.constant 1.000000e+00 : f32
    %239 = vector.broadcast %cst_81 : f32 to vector<16x128xf32>
    %240 = arith.addf %239, %238 : vector<16x128xf32>
    %241 = arith.divf %239, %240 : vector<16x128xf32>
    %242 = arith.select %15, %236, %241 : vector<16x128xi1>, vector<16x128xf32>
    %243 = vector.extract_strided_slice %242 {offsets = [0, 0], sizes = [16, 32], strides = [1, 1]} : vector<16x128xf32> to vector<16x32xf32>
    %244 = vector.extract_strided_slice %242 {offsets = [0, 32], sizes = [16, 32], strides = [1, 1]} : vector<16x128xf32> to vector<16x32xf32>
    %245 = vector.extract_strided_slice %242 {offsets = [0, 64], sizes = [16, 32], strides = [1, 1]} : vector<16x128xf32> to vector<16x32xf32>
    %246 = vector.extract_strided_slice %242 {offsets = [0, 96], sizes = [16, 32], strides = [1, 1]} : vector<16x128xf32> to vector<16x32xf32>
    %247 = arith.mulf %244, %220 : vector<16x32xf32>
    %248 = arith.mulf %243, %245 : vector<16x32xf32>
    %249 = arith.addf %247, %248 : vector<16x32xf32>
    %250 = math.tanh %249 : vector<16x32xf32>
    %251 = arith.mulf %246, %250 : vector<16x32xf32>
    %252 = arith.truncf %251 : vector<16x32xf32> to vector<16x32xbf16>
    %253 = vector.extract_strided_slice %252 {offsets = [0, 0], sizes = [8, 32], strides = [1, 1]} : vector<16x32xbf16> to vector<8x32xbf16>
    %c56_82 = arith.constant 56 : index
    %c0_83 = arith.constant 0 : index
    %254 = vector.load %arg12[%c56_82, %c0_83] : memref<64x64xbf16, #tpu.memory_space<vmem>>, vector<8x32xbf16>
    tpu.vector_store %arg12[%c56_82, %c0_83], %253 {strides = array<i32>} : memref<64x64xbf16, #tpu.memory_space<vmem>>, vector<8x32xbf16>,
    %255 = vector.extract_strided_slice %252 {offsets = [8, 0], sizes = [8, 32], strides = [1, 1]} : vector<16x32xbf16> to vector<8x32xbf16>
    %c0_84 = arith.constant 0 : index
    %c32_85 = arith.constant 32 : index
    %256 = vector.load %arg12[%c0_84, %c32_85] : memref<64x64xbf16, #tpu.memory_space<vmem>>, vector<8x32xbf16>
    tpu.vector_store %arg12[%c0_84, %c32_85], %255 {strides = array<i32>} : memref<64x64xbf16, #tpu.memory_space<vmem>>, vector<8x32xbf16>,
    %c0_86 = arith.constant 0 : index
    %c0_87 = arith.constant 0 : index
    %257 = vector.load %arg12[%c0_86, %c0_87] : memref<64x64xbf16, #tpu.memory_space<vmem>>, vector<64x64xbf16>
    %c0_88 = arith.constant 0 : index
    %c0_89 = arith.constant 0 : index
    %258 = vector.load %arg5[%c0_88, %c0_89] : memref<64x256xbf16, #tpu.memory_space<vmem>>, vector<64x256xbf16>
    %cst_90 = arith.constant dense<0.000000e+00> : vector<64x256xf32>
    %259 = tpu.matmul %257, %258, %cst_90 {dimension_numbers = #tpu.dot_dimension_numbers<[1], [0], [0], [1], [0, 0, 1, 1], [], []>} : vector<64x64xbf16>, vector<64x256xbf16>, vector<64x256xf32> -> vector<64x256xf32>
    %c0_91 = arith.constant 0 : index
    %c0_92 = arith.constant 0 : index
    %260 = vector.load %arg7[%c0_91, %c0_92] : memref<1x256xf32, #tpu.memory_space<vmem>>, vector<1x256xf32>
    %261 = vector.broadcast %260 : vector<1x256xf32> to vector<64x256xf32>
    %262 = arith.addf %259, %261 : vector<64x256xf32>
    %c0_93 = arith.constant 0 : index
    %c0_94 = arith.constant 0 : index
    %263 = vector.load %arg11[%c0_93, %c0_94] : memref<64x256xf32, #tpu.memory_space<vmem>>, vector<64x256xf32>
    tpu.vector_store %arg11[%c0_93, %c0_94], %262 {strides = array<i32>} : memref<64x256xf32, #tpu.memory_space<vmem>>, vector<64x256xf32>,
    %c0_95 = arith.constant 0 : index
    %c0_96 = arith.constant 0 : index
    %264 = vector.load %arg6[%c0_95, %c0_96] : memref<32x256xbf16, #tpu.memory_space<vmem>>, vector<32x256xbf16>
    %cst_97 = arith.constant 0.000000e+00 : bf16
    %265 = vector.broadcast %cst_97 : bf16 to vector<16x32xbf16>
    %cst_98 = arith.constant 0.000000e+00 : f32
    %266 = vector.broadcast %cst_98 : f32 to vector<16x32xf32>
    %cst_99 = arith.constant dense<0.000000e+00> : vector<16x256xf32>
    %267 = tpu.matmul %265, %264, %cst_99 {dimension_numbers = #tpu.dot_dimension_numbers<[1], [0], [0], [1], [0, 0, 1, 1], [], []>} : vector<16x32xbf16>, vector<32x256xbf16>, vector<16x256xf32> -> vector<16x256xf32>
    %c0_100 = arith.constant 0 : index
    %c0_101 = arith.constant 0 : index
    %268 = vector.load %arg11[%c0_100, %c0_101] : memref<64x256xf32, #tpu.memory_space<vmem>>, vector<8x128xf32>
    %269 = vector.extract_strided_slice %267 {offsets = [0, 0], sizes = [8, 128], strides = [1, 1]} : vector<16x256xf32> to vector<8x128xf32>
    %270 = arith.addf %268, %269 : vector<8x128xf32>
    %c56_102 = arith.constant 56 : index
    %c128_103 = arith.constant 128 : index
    %271 = vector.load %arg11[%c56_102, %c128_103] : memref<64x256xf32, #tpu.memory_space<vmem>>, vector<8x128xf32>
    %272 = vector.extract_strided_slice %267 {offsets = [8, 128], sizes = [8, 128], strides = [1, 1]} : vector<16x256xf32> to vector<8x128xf32>
    %273 = arith.addf %271, %272 : vector<8x128xf32>
    %274 = tpu.concatenate %270, %273 in 0 : vector<8x128xf32>, vector<8x128xf32> -> vector<16x128xf32>
    %275 = math.tanh %274 : vector<16x128xf32>
    %276 = arith.negf %274 : vector<16x128xf32>
    %277 = math.exp %276 : vector<16x128xf32>
    %cst_104 = arith.constant 1.000000e+00 : f32
    %278 = vector.broadcast %cst_104 : f32 to vector<16x128xf32>
    %279 = arith.addf %278, %277 : vector<16x128xf32>
    %280 = arith.divf %278, %279 : vector<16x128xf32>
    %281 = arith.select %15, %275, %280 : vector<16x128xi1>, vector<16x128xf32>
    %282 = vector.extract_strided_slice %281 {offsets = [0, 0], sizes = [16, 32], strides = [1, 1]} : vector<16x128xf32> to vector<16x32xf32>
    %283 = vector.extract_strided_slice %281 {offsets = [0, 32], sizes = [16, 32], strides = [1, 1]} : vector<16x128xf32> to vector<16x32xf32>
    %284 = vector.extract_strided_slice %281 {offsets = [0, 64], sizes = [16, 32], strides = [1, 1]} : vector<16x128xf32> to vector<16x32xf32>
    %285 = vector.extract_strided_slice %281 {offsets = [0, 96], sizes = [16, 32], strides = [1, 1]} : vector<16x128xf32> to vector<16x32xf32>
    %286 = arith.mulf %283, %266 : vector<16x32xf32>
    %287 = arith.mulf %282, %284 : vector<16x32xf32>
    %288 = arith.addf %286, %287 : vector<16x32xf32>
    %289 = math.tanh %288 : vector<16x32xf32>
    %290 = arith.mulf %285, %289 : vector<16x32xf32>
    %291 = arith.truncf %290 : vector<16x32xf32> to vector<16x32xbf16>
    %cst_105 = arith.constant dense<0.000000e+00> : vector<16x256xf32>
    %292 = tpu.matmul %291, %264, %cst_105 {dimension_numbers = #tpu.dot_dimension_numbers<[1], [0], [0], [1], [0, 0, 1, 1], [], []>} : vector<16x32xbf16>, vector<32x256xbf16>, vector<16x256xf32> -> vector<16x256xf32>
    %c8_106 = arith.constant 8 : index
    %c0_107 = arith.constant 0 : index
    %293 = vector.load %arg11[%c8_106, %c0_107] : memref<64x256xf32, #tpu.memory_space<vmem>>, vector<8x128xf32>
    %294 = vector.extract_strided_slice %292 {offsets = [0, 0], sizes = [8, 128], strides = [1, 1]} : vector<16x256xf32> to vector<8x128xf32>
    %295 = arith.addf %293, %294 : vector<8x128xf32>
    %c48_108 = arith.constant 48 : index
    %c128_109 = arith.constant 128 : index
    %296 = vector.load %arg11[%c48_108, %c128_109] : memref<64x256xf32, #tpu.memory_space<vmem>>, vector<8x128xf32>
    %297 = vector.extract_strided_slice %292 {offsets = [8, 128], sizes = [8, 128], strides = [1, 1]} : vector<16x256xf32> to vector<8x128xf32>
    %298 = arith.addf %296, %297 : vector<8x128xf32>
    %299 = tpu.concatenate %295, %298 in 0 : vector<8x128xf32>, vector<8x128xf32> -> vector<16x128xf32>
    %300 = math.tanh %299 : vector<16x128xf32>
    %301 = arith.negf %299 : vector<16x128xf32>
    %302 = math.exp %301 : vector<16x128xf32>
    %cst_110 = arith.constant 1.000000e+00 : f32
    %303 = vector.broadcast %cst_110 : f32 to vector<16x128xf32>
    %304 = arith.addf %303, %302 : vector<16x128xf32>
    %305 = arith.divf %303, %304 : vector<16x128xf32>
    %306 = arith.select %15, %300, %305 : vector<16x128xi1>, vector<16x128xf32>
    %307 = vector.extract_strided_slice %306 {offsets = [0, 0], sizes = [16, 32], strides = [1, 1]} : vector<16x128xf32> to vector<16x32xf32>
    %308 = vector.extract_strided_slice %306 {offsets = [0, 32], sizes = [16, 32], strides = [1, 1]} : vector<16x128xf32> to vector<16x32xf32>
    %309 = vector.extract_strided_slice %306 {offsets = [0, 64], sizes = [16, 32], strides = [1, 1]} : vector<16x128xf32> to vector<16x32xf32>
    %310 = vector.extract_strided_slice %306 {offsets = [0, 96], sizes = [16, 32], strides = [1, 1]} : vector<16x128xf32> to vector<16x32xf32>
    %311 = arith.mulf %308, %288 : vector<16x32xf32>
    %312 = arith.mulf %307, %309 : vector<16x32xf32>
    %313 = arith.addf %311, %312 : vector<16x32xf32>
    %314 = math.tanh %313 : vector<16x32xf32>
    %315 = arith.mulf %310, %314 : vector<16x32xf32>
    %316 = arith.truncf %315 : vector<16x32xf32> to vector<16x32xbf16>
    %cst_111 = arith.constant dense<0.000000e+00> : vector<16x256xf32>
    %317 = tpu.matmul %316, %264, %cst_111 {dimension_numbers = #tpu.dot_dimension_numbers<[1], [0], [0], [1], [0, 0, 1, 1], [], []>} : vector<16x32xbf16>, vector<32x256xbf16>, vector<16x256xf32> -> vector<16x256xf32>
    %c16_112 = arith.constant 16 : index
    %c0_113 = arith.constant 0 : index
    %318 = vector.load %arg11[%c16_112, %c0_113] : memref<64x256xf32, #tpu.memory_space<vmem>>, vector<8x128xf32>
    %319 = vector.extract_strided_slice %317 {offsets = [0, 0], sizes = [8, 128], strides = [1, 1]} : vector<16x256xf32> to vector<8x128xf32>
    %320 = arith.addf %318, %319 : vector<8x128xf32>
    %c40_114 = arith.constant 40 : index
    %c128_115 = arith.constant 128 : index
    %321 = vector.load %arg11[%c40_114, %c128_115] : memref<64x256xf32, #tpu.memory_space<vmem>>, vector<8x128xf32>
    %322 = vector.extract_strided_slice %317 {offsets = [8, 128], sizes = [8, 128], strides = [1, 1]} : vector<16x256xf32> to vector<8x128xf32>
    %323 = arith.addf %321, %322 : vector<8x128xf32>
    %324 = tpu.concatenate %320, %323 in 0 : vector<8x128xf32>, vector<8x128xf32> -> vector<16x128xf32>
    %325 = math.tanh %324 : vector<16x128xf32>
    %326 = arith.negf %324 : vector<16x128xf32>
    %327 = math.exp %326 : vector<16x128xf32>
    %cst_116 = arith.constant 1.000000e+00 : f32
    %328 = vector.broadcast %cst_116 : f32 to vector<16x128xf32>
    %329 = arith.addf %328, %327 : vector<16x128xf32>
    %330 = arith.divf %328, %329 : vector<16x128xf32>
    %331 = arith.select %15, %325, %330 : vector<16x128xi1>, vector<16x128xf32>
    %332 = vector.extract_strided_slice %331 {offsets = [0, 0], sizes = [16, 32], strides = [1, 1]} : vector<16x128xf32> to vector<16x32xf32>
    %333 = vector.extract_strided_slice %331 {offsets = [0, 32], sizes = [16, 32], strides = [1, 1]} : vector<16x128xf32> to vector<16x32xf32>
    %334 = vector.extract_strided_slice %331 {offsets = [0, 64], sizes = [16, 32], strides = [1, 1]} : vector<16x128xf32> to vector<16x32xf32>
    %335 = vector.extract_strided_slice %331 {offsets = [0, 96], sizes = [16, 32], strides = [1, 1]} : vector<16x128xf32> to vector<16x32xf32>
    %336 = arith.mulf %333, %313 : vector<16x32xf32>
    %337 = arith.mulf %332, %334 : vector<16x32xf32>
    %338 = arith.addf %336, %337 : vector<16x32xf32>
    %339 = math.tanh %338 : vector<16x32xf32>
    %340 = arith.mulf %335, %339 : vector<16x32xf32>
    %341 = arith.truncf %340 : vector<16x32xf32> to vector<16x32xbf16>
    %cst_117 = arith.constant dense<0.000000e+00> : vector<16x256xf32>
    %342 = tpu.matmul %341, %264, %cst_117 {dimension_numbers = #tpu.dot_dimension_numbers<[1], [0], [0], [1], [0, 0, 1, 1], [], []>} : vector<16x32xbf16>, vector<32x256xbf16>, vector<16x256xf32> -> vector<16x256xf32>
    %c24_118 = arith.constant 24 : index
    %c0_119 = arith.constant 0 : index
    %343 = vector.load %arg11[%c24_118, %c0_119] : memref<64x256xf32, #tpu.memory_space<vmem>>, vector<8x128xf32>
    %344 = vector.extract_strided_slice %342 {offsets = [0, 0], sizes = [8, 128], strides = [1, 1]} : vector<16x256xf32> to vector<8x128xf32>
    %345 = arith.addf %343, %344 : vector<8x128xf32>
    %c32_120 = arith.constant 32 : index
    %c128_121 = arith.constant 128 : index
    %346 = vector.load %arg11[%c32_120, %c128_121] : memref<64x256xf32, #tpu.memory_space<vmem>>, vector<8x128xf32>
    %347 = vector.extract_strided_slice %342 {offsets = [8, 128], sizes = [8, 128], strides = [1, 1]} : vector<16x256xf32> to vector<8x128xf32>
    %348 = arith.addf %346, %347 : vector<8x128xf32>
    %349 = tpu.concatenate %345, %348 in 0 : vector<8x128xf32>, vector<8x128xf32> -> vector<16x128xf32>
    %350 = math.tanh %349 : vector<16x128xf32>
    %351 = arith.negf %349 : vector<16x128xf32>
    %352 = math.exp %351 : vector<16x128xf32>
    %cst_122 = arith.constant 1.000000e+00 : f32
    %353 = vector.broadcast %cst_122 : f32 to vector<16x128xf32>
    %354 = arith.addf %353, %352 : vector<16x128xf32>
    %355 = arith.divf %353, %354 : vector<16x128xf32>
    %356 = arith.select %15, %350, %355 : vector<16x128xi1>, vector<16x128xf32>
    %357 = vector.extract_strided_slice %356 {offsets = [0, 0], sizes = [16, 32], strides = [1, 1]} : vector<16x128xf32> to vector<16x32xf32>
    %358 = vector.extract_strided_slice %356 {offsets = [0, 32], sizes = [16, 32], strides = [1, 1]} : vector<16x128xf32> to vector<16x32xf32>
    %359 = vector.extract_strided_slice %356 {offsets = [0, 64], sizes = [16, 32], strides = [1, 1]} : vector<16x128xf32> to vector<16x32xf32>
    %360 = vector.extract_strided_slice %356 {offsets = [0, 96], sizes = [16, 32], strides = [1, 1]} : vector<16x128xf32> to vector<16x32xf32>
    %361 = arith.mulf %358, %338 : vector<16x32xf32>
    %362 = arith.mulf %357, %359 : vector<16x32xf32>
    %363 = arith.addf %361, %362 : vector<16x32xf32>
    %364 = math.tanh %363 : vector<16x32xf32>
    %365 = arith.mulf %360, %364 : vector<16x32xf32>
    %366 = arith.truncf %365 : vector<16x32xf32> to vector<16x32xbf16>
    %cst_123 = arith.constant dense<0.000000e+00> : vector<16x256xf32>
    %367 = tpu.matmul %366, %264, %cst_123 {dimension_numbers = #tpu.dot_dimension_numbers<[1], [0], [0], [1], [0, 0, 1, 1], [], []>} : vector<16x32xbf16>, vector<32x256xbf16>, vector<16x256xf32> -> vector<16x256xf32>
    %c32_124 = arith.constant 32 : index
    %c0_125 = arith.constant 0 : index
    %368 = vector.load %arg11[%c32_124, %c0_125] : memref<64x256xf32, #tpu.memory_space<vmem>>, vector<8x128xf32>
    %369 = vector.extract_strided_slice %367 {offsets = [0, 0], sizes = [8, 128], strides = [1, 1]} : vector<16x256xf32> to vector<8x128xf32>
    %370 = arith.addf %368, %369 : vector<8x128xf32>
    %c24_126 = arith.constant 24 : index
    %c128_127 = arith.constant 128 : index
    %371 = vector.load %arg11[%c24_126, %c128_127] : memref<64x256xf32, #tpu.memory_space<vmem>>, vector<8x128xf32>
    %372 = vector.extract_strided_slice %367 {offsets = [8, 128], sizes = [8, 128], strides = [1, 1]} : vector<16x256xf32> to vector<8x128xf32>
    %373 = arith.addf %371, %372 : vector<8x128xf32>
    %374 = tpu.concatenate %370, %373 in 0 : vector<8x128xf32>, vector<8x128xf32> -> vector<16x128xf32>
    %375 = math.tanh %374 : vector<16x128xf32>
    %376 = arith.negf %374 : vector<16x128xf32>
    %377 = math.exp %376 : vector<16x128xf32>
    %cst_128 = arith.constant 1.000000e+00 : f32
    %378 = vector.broadcast %cst_128 : f32 to vector<16x128xf32>
    %379 = arith.addf %378, %377 : vector<16x128xf32>
    %380 = arith.divf %378, %379 : vector<16x128xf32>
    %381 = arith.select %15, %375, %380 : vector<16x128xi1>, vector<16x128xf32>
    %382 = vector.extract_strided_slice %381 {offsets = [0, 0], sizes = [16, 32], strides = [1, 1]} : vector<16x128xf32> to vector<16x32xf32>
    %383 = vector.extract_strided_slice %381 {offsets = [0, 32], sizes = [16, 32], strides = [1, 1]} : vector<16x128xf32> to vector<16x32xf32>
    %384 = vector.extract_strided_slice %381 {offsets = [0, 64], sizes = [16, 32], strides = [1, 1]} : vector<16x128xf32> to vector<16x32xf32>
    %385 = vector.extract_strided_slice %381 {offsets = [0, 96], sizes = [16, 32], strides = [1, 1]} : vector<16x128xf32> to vector<16x32xf32>
    %386 = arith.mulf %383, %363 : vector<16x32xf32>
    %387 = arith.mulf %382, %384 : vector<16x32xf32>
    %388 = arith.addf %386, %387 : vector<16x32xf32>
    %389 = math.tanh %388 : vector<16x32xf32>
    %390 = arith.mulf %385, %389 : vector<16x32xf32>
    %391 = arith.truncf %390 : vector<16x32xf32> to vector<16x32xbf16>
    %cst_129 = arith.constant dense<0.000000e+00> : vector<16x256xf32>
    %392 = tpu.matmul %391, %264, %cst_129 {dimension_numbers = #tpu.dot_dimension_numbers<[1], [0], [0], [1], [0, 0, 1, 1], [], []>} : vector<16x32xbf16>, vector<32x256xbf16>, vector<16x256xf32> -> vector<16x256xf32>
    %c40_130 = arith.constant 40 : index
    %c0_131 = arith.constant 0 : index
    %393 = vector.load %arg11[%c40_130, %c0_131] : memref<64x256xf32, #tpu.memory_space<vmem>>, vector<8x128xf32>
    %394 = vector.extract_strided_slice %392 {offsets = [0, 0], sizes = [8, 128], strides = [1, 1]} : vector<16x256xf32> to vector<8x128xf32>
    %395 = arith.addf %393, %394 : vector<8x128xf32>
    %c16_132 = arith.constant 16 : index
    %c128_133 = arith.constant 128 : index
    %396 = vector.load %arg11[%c16_132, %c128_133] : memref<64x256xf32, #tpu.memory_space<vmem>>, vector<8x128xf32>
    %397 = vector.extract_strided_slice %392 {offsets = [8, 128], sizes = [8, 128], strides = [1, 1]} : vector<16x256xf32> to vector<8x128xf32>
    %398 = arith.addf %396, %397 : vector<8x128xf32>
    %399 = tpu.concatenate %395, %398 in 0 : vector<8x128xf32>, vector<8x128xf32> -> vector<16x128xf32>
    %400 = math.tanh %399 : vector<16x128xf32>
    %401 = arith.negf %399 : vector<16x128xf32>
    %402 = math.exp %401 : vector<16x128xf32>
    %cst_134 = arith.constant 1.000000e+00 : f32
    %403 = vector.broadcast %cst_134 : f32 to vector<16x128xf32>
    %404 = arith.addf %403, %402 : vector<16x128xf32>
    %405 = arith.divf %403, %404 : vector<16x128xf32>
    %406 = arith.select %15, %400, %405 : vector<16x128xi1>, vector<16x128xf32>
    %407 = vector.extract_strided_slice %406 {offsets = [0, 0], sizes = [16, 32], strides = [1, 1]} : vector<16x128xf32> to vector<16x32xf32>
    %408 = vector.extract_strided_slice %406 {offsets = [0, 32], sizes = [16, 32], strides = [1, 1]} : vector<16x128xf32> to vector<16x32xf32>
    %409 = vector.extract_strided_slice %406 {offsets = [0, 64], sizes = [16, 32], strides = [1, 1]} : vector<16x128xf32> to vector<16x32xf32>
    %410 = vector.extract_strided_slice %406 {offsets = [0, 96], sizes = [16, 32], strides = [1, 1]} : vector<16x128xf32> to vector<16x32xf32>
    %411 = arith.mulf %408, %388 : vector<16x32xf32>
    %412 = arith.mulf %407, %409 : vector<16x32xf32>
    %413 = arith.addf %411, %412 : vector<16x32xf32>
    %414 = math.tanh %413 : vector<16x32xf32>
    %415 = arith.mulf %410, %414 : vector<16x32xf32>
    %416 = arith.truncf %415 : vector<16x32xf32> to vector<16x32xbf16>
    %cst_135 = arith.constant dense<0.000000e+00> : vector<16x256xf32>
    %417 = tpu.matmul %416, %264, %cst_135 {dimension_numbers = #tpu.dot_dimension_numbers<[1], [0], [0], [1], [0, 0, 1, 1], [], []>} : vector<16x32xbf16>, vector<32x256xbf16>, vector<16x256xf32> -> vector<16x256xf32>
    %c48_136 = arith.constant 48 : index
    %c0_137 = arith.constant 0 : index
    %418 = vector.load %arg11[%c48_136, %c0_137] : memref<64x256xf32, #tpu.memory_space<vmem>>, vector<8x128xf32>
    %419 = vector.extract_strided_slice %417 {offsets = [0, 0], sizes = [8, 128], strides = [1, 1]} : vector<16x256xf32> to vector<8x128xf32>
    %420 = arith.addf %418, %419 : vector<8x128xf32>
    %c8_138 = arith.constant 8 : index
    %c128_139 = arith.constant 128 : index
    %421 = vector.load %arg11[%c8_138, %c128_139] : memref<64x256xf32, #tpu.memory_space<vmem>>, vector<8x128xf32>
    %422 = vector.extract_strided_slice %417 {offsets = [8, 128], sizes = [8, 128], strides = [1, 1]} : vector<16x256xf32> to vector<8x128xf32>
    %423 = arith.addf %421, %422 : vector<8x128xf32>
    %424 = tpu.concatenate %420, %423 in 0 : vector<8x128xf32>, vector<8x128xf32> -> vector<16x128xf32>
    %425 = math.tanh %424 : vector<16x128xf32>
    %426 = arith.negf %424 : vector<16x128xf32>
    %427 = math.exp %426 : vector<16x128xf32>
    %cst_140 = arith.constant 1.000000e+00 : f32
    %428 = vector.broadcast %cst_140 : f32 to vector<16x128xf32>
    %429 = arith.addf %428, %427 : vector<16x128xf32>
    %430 = arith.divf %428, %429 : vector<16x128xf32>
    %431 = arith.select %15, %425, %430 : vector<16x128xi1>, vector<16x128xf32>
    %432 = vector.extract_strided_slice %431 {offsets = [0, 0], sizes = [16, 32], strides = [1, 1]} : vector<16x128xf32> to vector<16x32xf32>
    %433 = vector.extract_strided_slice %431 {offsets = [0, 32], sizes = [16, 32], strides = [1, 1]} : vector<16x128xf32> to vector<16x32xf32>
    %434 = vector.extract_strided_slice %431 {offsets = [0, 64], sizes = [16, 32], strides = [1, 1]} : vector<16x128xf32> to vector<16x32xf32>
    %435 = vector.extract_strided_slice %431 {offsets = [0, 96], sizes = [16, 32], strides = [1, 1]} : vector<16x128xf32> to vector<16x32xf32>
    %436 = arith.mulf %433, %413 : vector<16x32xf32>
    %437 = arith.mulf %432, %434 : vector<16x32xf32>
    %438 = arith.addf %436, %437 : vector<16x32xf32>
    %439 = math.tanh %438 : vector<16x32xf32>
    %440 = arith.mulf %435, %439 : vector<16x32xf32>
    %441 = arith.truncf %440 : vector<16x32xf32> to vector<16x32xbf16>
    %cst_141 = arith.constant dense<0.000000e+00> : vector<16x256xf32>
    %442 = tpu.matmul %441, %264, %cst_141 {dimension_numbers = #tpu.dot_dimension_numbers<[1], [0], [0], [1], [0, 0, 1, 1], [], []>} : vector<16x32xbf16>, vector<32x256xbf16>, vector<16x256xf32> -> vector<16x256xf32>
    %c56_142 = arith.constant 56 : index
    %c0_143 = arith.constant 0 : index
    %443 = vector.load %arg11[%c56_142, %c0_143] : memref<64x256xf32, #tpu.memory_space<vmem>>, vector<8x128xf32>
    %444 = vector.extract_strided_slice %442 {offsets = [0, 0], sizes = [8, 128], strides = [1, 1]} : vector<16x256xf32> to vector<8x128xf32>
    %445 = arith.addf %443, %444 : vector<8x128xf32>
    %c0_144 = arith.constant 0 : index
    %c128_145 = arith.constant 128 : index
    %446 = vector.load %arg11[%c0_144, %c128_145] : memref<64x256xf32, #tpu.memory_space<vmem>>, vector<8x128xf32>
    %447 = vector.extract_strided_slice %442 {offsets = [8, 128], sizes = [8, 128], strides = [1, 1]} : vector<16x256xf32> to vector<8x128xf32>
    %448 = arith.addf %446, %447 : vector<8x128xf32>
    %449 = tpu.concatenate %445, %448 in 0 : vector<8x128xf32>, vector<8x128xf32> -> vector<16x128xf32>
    %450 = math.tanh %449 : vector<16x128xf32>
    %451 = arith.negf %449 : vector<16x128xf32>
    %452 = math.exp %451 : vector<16x128xf32>
    %cst_146 = arith.constant 1.000000e+00 : f32
    %453 = vector.broadcast %cst_146 : f32 to vector<16x128xf32>
    %454 = arith.addf %453, %452 : vector<16x128xf32>
    %455 = arith.divf %453, %454 : vector<16x128xf32>
    %456 = arith.select %15, %450, %455 : vector<16x128xi1>, vector<16x128xf32>
    %457 = vector.extract_strided_slice %456 {offsets = [0, 0], sizes = [16, 32], strides = [1, 1]} : vector<16x128xf32> to vector<16x32xf32>
    %458 = vector.extract_strided_slice %456 {offsets = [0, 32], sizes = [16, 32], strides = [1, 1]} : vector<16x128xf32> to vector<16x32xf32>
    %459 = vector.extract_strided_slice %456 {offsets = [0, 64], sizes = [16, 32], strides = [1, 1]} : vector<16x128xf32> to vector<16x32xf32>
    %460 = vector.extract_strided_slice %456 {offsets = [0, 96], sizes = [16, 32], strides = [1, 1]} : vector<16x128xf32> to vector<16x32xf32>
    %461 = arith.mulf %458, %438 : vector<16x32xf32>
    %462 = arith.mulf %457, %459 : vector<16x32xf32>
    %463 = arith.addf %461, %462 : vector<16x32xf32>
    %464 = math.tanh %463 : vector<16x32xf32>
    %465 = arith.mulf %460, %464 : vector<16x32xf32>
    %466 = arith.truncf %465 : vector<16x32xf32> to vector<16x32xbf16>
    %467 = vector.extract_strided_slice %466 {offsets = [0, 0], sizes = [8, 32], strides = [1, 1]} : vector<16x32xbf16> to vector<8x32xbf16>
    %468 = vector.extract_strided_slice %466 {offsets = [8, 0], sizes = [8, 32], strides = [1, 1]} : vector<16x32xbf16> to vector<8x32xbf16>
    %469 = tpu.concatenate %467, %468 in 1 : vector<8x32xbf16>, vector<8x32xbf16> -> vector<8x64xbf16>
    %c0_147 = arith.constant 0 : index
    %c0_148 = arith.constant 0 : index
    %470 = vector.load %arg8[%c0_147, %c0_148] : memref<64x128xbf16, #tpu.memory_space<vmem>>, vector<64x128xbf16>
    %cst_149 = arith.constant dense<0.000000e+00> : vector<8x128xf32>
    %471 = tpu.matmul %469, %470, %cst_149 {dimension_numbers = #tpu.dot_dimension_numbers<[1], [0], [0], [1], [0, 0, 1, 1], [], []>} : vector<8x64xbf16>, vector<64x128xbf16>, vector<8x128xf32> -> vector<8x128xf32>
    %c0_150 = arith.constant 0 : index
    %c0_151 = arith.constant 0 : index
    %472 = vector.load %arg9[%c0_150, %c0_151] : memref<1x128xf32, #tpu.memory_space<vmem>>, vector<1x128xf32>
    %473 = vector.broadcast %472 : vector<1x128xf32> to vector<8x128xf32>
    %474 = arith.addf %471, %473 : vector<8x128xf32>
    %c0_152 = arith.constant 0 : index
    %c0_153 = arith.constant 0 : index
    %475 = vector.load %arg10[%c0_152, %c0_153] : memref<8x128xf32, #tpu.memory_space<vmem>>, vector<8x128xf32>
    tpu.vector_store %arg10[%c0_152, %c0_153], %474 {strides = array<i32>} : memref<8x128xf32, #tpu.memory_space<vmem>>, vector<8x128xf32>,
    return
  }
}

</mosaic_0001>

<bundles_post_ra>
// kernel: model_forward.1
= control target key start
LH: loop header
LB: loop body
LE: loop exit
PB: predicated region body
PF: predicated region fallthrough
CT: control target
= control target key end

     0   :  { %15 = vsyncpa [#allocation5], 0  ;;  %s3569_s0 = inlined_call_operand.vmem [shape: s32[64,1], index: 0, kind: input, shape index: {}]   ;;  %s3570_s1 = inlined_call_operand.vmem [shape: bf16[50,32], index: 1, kind: input, shape index: {}]   ;;  %s3571_s2 = inlined_call_operand.vmem [shape: bf16[32,256], index: 2, kind: input, shape index: {}]   ;;  %s3572_s3 = inlined_call_operand.vmem [shape: bf16[32,256], index: 3, kind: input, shape index: {}]   ;;  %s3573_s4 = inlined_call_operand.vmem [shape: f32[1,256], index: 4, kind: input, shape index: {}]   ;;  %s3574_s5 = inlined_call_operand.vmem [shape: bf16[64,256], index: 5, kind: input, shape index: {}]   ;;  %s3575_s6 = inlined_call_operand.vmem [shape: bf16[32,256], index: 6, kind: input, shape index: {}]   ;;  %s3576_s7 = inlined_call_operand.hbm [shape: f32[1,256], index: 7, kind: input, shape index: {}]   ;;  %s3577_s8 = inlined_call_operand.hbm [shape: bf16[64,128], index: 8, kind: input, shape index: {}]   ;;  %s3578_s9 = inlined_call_operand.vmem [shape: f32[1,128], index: 9, kind: input, shape index: {}]   ;;  %s3579_s10 = inlined_call_operand.vmem [shape: f32[8,128], index: 10, kind: output, shape index: {}]  }
   0x1   :  { %16 = vsyncpa [#allocation7], 0  ;;  %s2868_s13 = smov [#allocation4]   ;;  %s2869_s15 = smov [#allocation6]  }
   0x2   :  { %s37_s14 = sshll.u32 %s2868_s13, 4  ;;  %s46_s16 = sshll.u32 %s2869_s15, 4  ;;  %s38_s14 = int_to_ptr.vmem [resolvable:$true] %s37_s14  ;;  %s2931_s16 = int_to_ptr.vmem [resolvable:$true] %s46_s16 }
   0x3   :  { %s2820_s19 = scalar_lea.hbm %s3576_s7, 32 }
   0x4   :  { %p2821_p0 = scmp.ne.s32.totalorder %s3576_s7, %s2820_s19  ;;  %p2824_p1 = scmp.lt.u32.totalorder %s2820_s19, %s3576_s7 }
   0x6   :  { %p2826_p2 = pnand %p2824_p1, %p2821_p0 }
   0x8   :  { %2829 = shalt.err (!%p2826_p2)
}
   0x9   :  { %s2830_s24 = scalar_lea.vmem %s38_s14, 32  ;;  %p2835_p4 = scmp.lt.s32.totalorder %s38_s14, %s38_s14 }
   0xa   :  { %p2831_p3 = scmp.ne.s32.totalorder %s38_s14, %s2830_s24  ;;  %p2836_p5 = scmp.lt.s32.totalorder %s2830_s24, %s2830_s24 }
   0xc   :  { %p2837_p6 = por %p2836_p5, %p2835_p4 }
   0xe   :  { %p2838_p7 = pnand %p2837_p6, %p2831_p3 }
  0x10   :  { %2841 = shalt.err (!%p2838_p7)
}
  0x11   :  { %40 = dma.hbm_to_vmem [thread:$0]  %s3576_s7, 32, %s38_s14, [#allocation5]  }
  0x12   :  { %s2842_s29 = scalar_lea.hbm %s3577_s8, 512 }
  0x13   :  { %p2843_p8 = scmp.ne.s32.totalorder %s3577_s8, %s2842_s29  ;;  %p2846_p9 = scmp.lt.u32.totalorder %s2842_s29, %s3577_s8 }
  0x15   :  { %p2848_p10 = pnand %p2846_p9, %p2843_p8 }
  0x17   :  { %2851 = shalt.err (!%p2848_p10)
}
  0x18   :  { %s2852_s15 = scalar_lea.vmem %s2931_s16, 512  ;;  %p2857_p12 = scmp.lt.s32.totalorder %s2931_s16, %s2931_s16 }
  0x19   :  { %p2853_p11 = scmp.ne.s32.totalorder %s2931_s16, %s2852_s15  ;;  %p2858_p13 = scmp.lt.s32.totalorder %s2852_s15, %s2852_s15 }
  0x1b   :  { %p2859_p0 = por %p2858_p13, %p2857_p12 }
  0x1d   :  { %p2860_p1 = pnand %p2859_p0, %p2853_p11 }
  0x1f   :  { %2863 = shalt.err (!%p2860_p1)
}
  0x20   :  { %s2870_s7 = smov 64   ;;  %s2871_s14 = smov 4  }
  0x21   :  { %52 = dma.hbm_to_vmem [thread:$0]  %s3577_s8, 512, %s2931_s16, [#allocation7], %s2870_s7, %s2870_s7, %s2871_s14  }
  0x22   :  { %2864 = dma.done.wait [#allocation5], 32  }
  0x23   :  { %2865 = vsyncadd [#allocation5], 4294967264 }
  0x24   :  { %2866 = dma.done.wait [#allocation7], 512  }
  0x25   :  { %2867 = vsyncadd [#allocation7], 4294966784  ;;  %v2872_v0 = vmov 0   ;;  %v64_v1 = vld [vmem:[%s3569_s0 + $0x10] sm:$0xff]  ;;  %v62_v2 = vld [vmem:[%s3569_s0] sm:$0xff]  ;;  %vm165_vm0 = vcmask 1040384   ;;  %v70_v16 = vlaneseq }
  0x26   :  { %2525 = vset.pattern.permute.xlu1 %v2872_v0  ;;  %2524 = vset.pattern.permute.xlu0 %v2872_v0  ;;  %v65_v3 = vld [vmem:[%s3569_s0 + $0x18] sm:$0xff]  ;;  %v63_v4 = vld [vmem:[%s3569_s0 + $0x8] sm:$0xff]  ;;  %v2526_v5 = vld [vmem:[%s3570_s1] sm:$0xff]   ;;  %vm152_vm5 = vcmask 408576   ;;  %v2873_v22 = vmov 0.0   ;;  %vm277_vm10 = vcmask 261120  }
  0x27   :  { %322 = vmatprep.mubr.bf16.mxu1 %v2872_v0  ;;  %79 = vperm.xlu1 %2525, %v64_v1   ;;  %v67_v6 = vld [vmem:[%s3569_s0 + $0x28] sm:$0xff]  ;;  %v66_v8 = vld [vmem:[%s3569_s0 + $0x20] sm:$0xff]  ;;  %v2528_v9 = vld [vmem:[%s3570_s1 + $0x10] sm:$0xff]   ;;  %v3010_v17 = vand.u32 127, %v70_v16  ;;  %v3084_v57 = vshrl.u32 %v70_v16, 7  ;;  %vm506_vm14 = vcmask 257024  }
  0x28   :  { %73 = vperm.xlu0 %2524, %v62_v2   ;;  %v2527_v7 = vld [vmem:[%s3570_s1 + $0x8] sm:$0xff]   ;;  %2487 = vmatprep.subr.bf16.mxu0 %v2526_v5  ;;  %v69_v10 = vld [vmem:[%s3569_s0 + $0x38] sm:$0xff]  ;;  %v68_v11 = vld [vmem:[%s3569_s0 + $0x30] sm:$0xff]  ;;  %vm617_vm15 = vcmask 261124  }
  0x29   :  { %2488 = vmatpush3.bf16.msra.mxu0 %v2526_v5  ;;  %v2529_v12 = vld [vmem:[%s3570_s1 + $0x18] ss:$0 sps:$4 sm:$0x11]   ;;  %v2530_v14 = vld [vmem:[%s3571_s2 + $0x4] ss:$8 sps:$4 sm:$0xff]   ;;  %v253_v58 = vsub.s32 1, %v3084_v57 }
  0x2a   :  { %2489 = vmatprep.subr.bf16.mxu0 %v2527_v7  ;;  %v167_v13 = vsel %vm165_vm0, %v2529_v12, 0  ;;  %v2532_v15 = vld [vmem:[%s3571_s2] ss:$8 sps:$4 sm:$0xff]   ;;  %290 = vmatprep.subr.bf16.mxu1 %v2530_v14  ;;  %v2533_v39 = vld [vmem:[%s3571_s2 + $0x14] ss:$8 sps:$4 sm:$0xff]   ;;  %v249_v60 = vsub.s32 0, %v3084_v57 }
  0x2b   :  { %82 = vperm.xlu1 %2525, %v65_v3   ;;  %291 = vmatpush1.bf16.msra.mxu1 %v2532_v15  ;;  %v2535_v40 = vld [vmem:[%s3571_s2 + $0x10] ss:$8 sps:$4 sm:$0xff]   ;;  %v3042_v41 = vld [vmem:[%s3572_s3 + $0x4] ss:$8 sps:$4 sm:$0xff]   ;;  %v3048_v42 = vld [vmem:[%s3572_s3] ss:$8 sps:$4 sm:$0xff]  }
  0x2c   :  { %76 = vperm.xlu0 %2524, %v63_v4   ;;  %292 = vmatprep.subr.bf16.mxu1 %v2533_v39  ;;  %v3055_v43 = vld [vmem:[%s3572_s3 + $0x14] ss:$8 sps:$4 sm:$0xff]   ;;  %v3061_v44 = vld [vmem:[%s3572_s3 + $0x10] ss:$8 sps:$4 sm:$0xff]   ;;  %v245_v59 = vld [vmem:[%s3573_s4] sm:$0x3] }
  0x2d   :  { %2490 = vmatpush3.bf16.msra.mxu0 %v2527_v7  ;;  %v254_v61 = vrot.slane %v245_v59, %v253_v58  ;;  %v250_v63 = vrot.slane %v245_v59, %v249_v60  ;;  %vm238_vm11 = vcmp.ge.s32.totalorder %v3010_v17, 64  ;;  %vm239_vm12 = vcmp.lt.s32.totalorder %v3010_v17, 96  ;;  %s2874_s4 = smov 32  }
  0x2e   :  { %2491 = vmatprep.subr.bf16.mxu0 %v2528_v9  ;;  %vm3125_vm13 = vmand %vm238_vm11, %vm239_vm12 }
  0x2f   :  { %88 = vperm.xlu1 %2525, %v67_v6   ;;  %293 = vmatpush1.bf16.msra.mxu1 %v2535_v40 }
  0x30   :  { %85 = vperm.xlu0 %2524, %v66_v8   ;;  %406 = vmatprep.subr.bf16.mxu1 %v3042_v41 }
  0x31   :  { %2492 = vmatpush3.bf16.msra.mxu0 %v2528_v9 }
  0x32   :  { %2515 = vmatprep.subr.msk.bf16.mxu0 %vm165_vm0, %v2529_v12  ;;  %vm511_vm0 = vcmask 523524  }
  0x33   :  { %94 = vperm.xlu1 %2525, %v69_v10  }
  0x34   :  { %91 = vperm.xlu0 %2524, %v68_v11  }
  0x35   :  { %2494 = vmatpush3.bf16.msra.mxu0 %v167_v13 }
  0x36   :  { %516 = vmatprep.subr.bf16.mxu0 %v3042_v41 }
  0xa6   :  { %v80_v18 = vpop.permute.xlu1 %79 }
  0xa7   :  { %v74_v19 = vpop.permute.xlu0 %73  ;;  %vm98_vm1 = vcmp.eq.s32.totalorder %v80_v18, %v3010_v17 }
  0xa8   :  { %vm96_vm2 = vcmp.eq.s32.totalorder %v74_v19, %v3010_v17  ;;  %v2380_v23 = vsel %vm98_vm1, 1.0, %v2873_v22  ;;  %vm622_vm1 = vcmask 519424  }
  0xa9   :  { %v2378_v25 = vsel %vm96_vm2, 1.0, %v2873_v22  ;;  %vm1345_vm2 = vcmask 523264  }
  0xaa   :  { %v83_v20 = vpop.permute.xlu1 %82 }
  0xab   :  { %v77_v21 = vpop.permute.xlu0 %76  ;;  %vm99_vm3 = vcmp.eq.s32.totalorder %v83_v20, %v3010_v17 }
  0xac   :  { %vm97_vm4 = vcmp.eq.s32.totalorder %v77_v21, %v3010_v17  ;;  %v2381_v24 = vsel %vm99_vm3, 1.0, %v2873_v22  ;;  %vm2875_vm3 = vmmov 0  }
  0xad   :  { %v2379_v26 = vsel %vm97_vm4, 1.0, %v2873_v22  ;;  %v121_v27 = vpack.c.bf16 %v2381_v24, %v2380_v23 }
  0xae   :  { %v120_v28 = vpack.c.bf16 %v2379_v26, %v2378_v25  ;;  %v89_v29 = vpop.permute.xlu1 %88 }
  0xaf   :  { %v86_v30 = vpop.permute.xlu0 %85  ;;  %vm101_vm6 = vcmp.eq.s32.totalorder %v89_v29, %v3010_v17 }
  0xb0   :  { %vm100_vm7 = vcmp.eq.s32.totalorder %v86_v30, %v3010_v17  ;;  %2495 = vmatprep.mubr.msk.bf16.mxu0 %vm152_vm5, %v120_v28  ;;  %v2383_v31 = vsel %vm101_vm6, 1.0, %v2873_v22 }
  0xb1   :  { %v2382_v32 = vsel %vm100_vm7, 1.0, %v2873_v22  ;;  %2496 = vmatmul.mubr.msk.bf16.vlgmr.msra.gmra.mrb[0].mxu0 %vm152_vm5, %v121_v27 }
  0xb2   :  { %v122_v33 = vpack.c.bf16 %v2383_v31, %v2382_v32  ;;  %v95_v34 = vpop.permute.xlu1 %94  ;;  %517 = vmatpush1.bf16.msra.mxu0 %v3048_v42 }
  0xb3   :  { %v92_v35 = vpop.permute.xlu0 %91  ;;  %vm103_vm8 = vcmp.eq.s32.totalorder %v95_v34, %v3010_v17  ;;  %518 = vmatprep.subr.bf16.mxu0 %v3055_v43 }
  0xb4   :  { %vm102_vm9 = vcmp.eq.s32.totalorder %v92_v35, %v3010_v17  ;;  %2499 = vmatprep.mubr.msk.bf16.mxu0 %vm152_vm5, %v122_v33  ;;  %v2385_v36 = vsel %vm103_vm8, 1.0, %v2873_v22 }
  0xb5   :  { %v2384_v37 = vsel %vm102_vm9, 1.0, %v2873_v22 }
  0xb6   :  { %v123_v38 = vpack.c.bf16 %v2385_v36, %v2384_v37  ;;  %519 = vmatpush1.bf16.msra.mxu0 %v3061_v44 }
  0xb7   :  { %737 = vmatprep.subr.bf16.mxu0 %v3042_v41 }
  0xb9   :  { %2500 = vmatmul.mubr.msk.bf16.gmra.mrb[4].mxu0 %vm152_vm5, %v123_v38 }
  0xba   :  { %548 = vmatprep.mubr.bf16.mxu0 %v2872_v0 }
 0x184   :  { %v2497_v45 = vpop.f32.mrb[0].mxu0 }
 0x185   :  { %v203_v46 = vpop.f32.mrb[1].mxu0 }
 0x186   :  { %v2498_v47 = vpop.f32.mrb[2].mxu0 }
 0x187   :  { %v235_v48 = vpack.c.bf16 %v2498_v47, %v2497_v45  ;;  %v206_v49 = vpop.f32.mrb[3].mxu0 }
 0x188   :  { %v234_v50 = vpack.c.bf16 %v206_v49, %v203_v46 }
 0x18a   :  { %2398 = vmatmul.mubr.msk.bf16.vlgmr.msra.gmra.mrb[0].mxu1 %vm277_vm10, %v234_v50  ;;  %v2560_v50 = vld [vmem:[#allocation6] sm:$0xff]  }
 0x18b   :  { %407 = vmatpush1.bf16.msra.mxu1 %v3048_v42  ;;  %332 = vmatprep.mubr.bf16.mxu1 %v2872_v0 }
 0x18c   :  { %v2501_v51 = vpop.f32.mrb[4].mxu0  ;;  %408 = vmatprep.subr.bf16.mxu1 %v3055_v43 }
 0x18d   :  { %v219_v52 = vpop.f32.mrb[5].mxu0 }
 0x18e   :  { %v2502_v53 = vpop.f32.mrb[6].mxu0 }
 0x18f   :  { %v237_v54 = vpack.c.bf16 %v2502_v53, %v2501_v51  ;;  %v222_v55 = vpop.f32.mrb[7].mxu0  ;;  %409 = vmatpush1.bf16.msra.mxu1 %v3061_v44 }
 0x190   :  { %v236_v56 = vpack.c.bf16 %v222_v55, %v219_v52  ;;  %629 = vmatprep.subr.bf16.mxu1 %v3042_v41 }
 0x192   :  { %2399 = vmatmul.mubr.msk.bf16.gmra.mrb[4].mxu1 %vm277_vm10, %v235_v48 }
 0x193   :  { %342 = vmatprep.mubr.bf16.mxu1 %v2872_v0 }
 0x19a   :  { %2400 = vmatmul.mubr.msk.bf16.gmra.mrb[8].mxu1 %vm277_vm10, %v236_v56 }
 0x19b   :  { %352 = vmatprep.mubr.bf16.mxu1 %v2872_v0 }
 0x1a2   :  { %2401 = vmatmul.mubr.msk.bf16.gmra.mrb[12].mxu1 %vm277_vm10, %v237_v54 }
 0x1a3   :  { %438 = vmatprep.mubr.bf16.mxu1 %v2872_v0 }
 0x1aa   :  { %439 = vmatmul.mubr.bf16.vlgmr.msra.gmra.mrb[16].mxu1 %v2872_v0 }
 0x1ab   :  { %630 = vmatpush1.bf16.msra.mxu1 %v3048_v42  ;;  %661 = vmatprep.mubr.bf16.mxu1 %v2872_v0 }
 0x1ac   :  { %631 = vmatprep.subr.bf16.mxu1 %v3055_v43 }
 0x1af   :  { %632 = vmatpush1.bf16.msra.mxu1 %v3061_v44 }
 0x1b0   :  { %848 = vmatprep.subr.bf16.mxu1 %v3042_v41 }
 0x25d   :  { %v324_v62 = vpop.f32.mrb[0].mxu1 }
 0x25e   :  { %v326_v1 = vpop.f32.mrb[1].mxu1  ;;  %v325_v32 = vadd.f32 %v324_v62, %v250_v63 }
 0x25f   :  { %v3095_v2 = vadd.f32 %v326_v1, %v254_v61  ;;  %v328_v3 = vpop.f32.mrb[2].mxu1 }
 0x260   :  { %v3097_v4 = vadd.f32 %v328_v3, %v250_v63  ;;  %v330_v5 = vpop.f32.mrb[3].mxu1 }
 0x261   :  { %v3099_v6 = vadd.f32 %v330_v5, %v254_v61 }
 0x265   :  { %v334_v7 = vpop.f32.mrb[4].mxu1 }
 0x266   :  { %v3101_v8 = vadd.f32 %v334_v7, %v250_v63  ;;  %v336_v9 = vpop.f32.mrb[5].mxu1 }
 0x267   :  { %v3103_v10 = vadd.f32 %v336_v9, %v254_v61  ;;  %v338_v11 = vpop.f32.mrb[6].mxu1 }
 0x268   :  { %v3105_v12 = vadd.f32 %v338_v11, %v250_v63  ;;  %v340_v13 = vpop.f32.mrb[7].mxu1 }
 0x269   :  { %v3107_v14 = vadd.f32 %v340_v13, %v254_v61 }
 0x26d   :  { %v344_v15 = vpop.f32.mrb[8].mxu1 }
 0x26e   :  { %v3109_v16 = vadd.f32 %v344_v15, %v250_v63  ;;  %v346_v18 = vpop.f32.mrb[9].mxu1 }
 0x26f   :  { %v3111_v19 = vadd.f32 %v346_v18, %v254_v61  ;;  %v348_v20 = vpop.f32.mrb[10].mxu1 }
 0x270   :  { %v3113_v21 = vadd.f32 %v348_v20, %v250_v63  ;;  %v350_v23 = vpop.f32.mrb[11].mxu1 }
 0x271   :  { %v3115_v24 = vadd.f32 %v350_v23, %v254_v61 }
 0x275   :  { %v354_v25 = vpop.f32.mrb[12].mxu1 }
 0x276   :  { %v3117_v26 = vadd.f32 %v354_v25, %v250_v63  ;;  %v356_v27 = vpop.f32.mrb[13].mxu1 }
 0x277   :  { %v3119_v28 = vadd.f32 %v356_v27, %v254_v61  ;;  %v358_v29 = vpop.f32.mrb[14].mxu1 }
 0x278   :  { %v3121_v30 = vadd.f32 %v358_v29, %v250_v63  ;;  %v360_v31 = vpop.f32.mrb[15].mxu1 }
 0x279   :  { %v361_v36 = vadd.f32 %v360_v31, %v254_v61 }
 0x27d   :  { %v440_v33 = vpop.f32.mrb[16].mxu1 }
 0x27e   :  { %v448_v34 = vadd.f32 %v440_v33, %v325_v32  ;;  %v442_v35 = vpop.f32.mrb[17].mxu1 }
 0x27f   :  { %v443_v37 = vpop.f32.mrb[18].mxu1 }
 0x280   :  { %v2406_v38 = vmul.f32 -1.442695, %v448_v34  ;;  %v444_v39 = vpop.f32.mrb[19].mxu1 }
 0x281   :  { %v450_v40 = vadd.f32 %v444_v39, %v361_v36 }
 0x282   :  { %2564 = vpow2.f32 %v2406_v38 }
 0x283   :  { %v2407_v45 = vmul.f32 -1.442695, %v450_v40 }
 0x285   :  { %2566 = vpow2.f32 %v2407_v45 }
 0x286   :  { %2568 = vtanh.f32 %v448_v34 }
 0x28c   :  { %v2565_v46 = vpop.eup %2564 }
 0x28d   :  { %v459_v47 = vadd.f32 1.0, %v2565_v46 }
 0x28f   :  { %v2567_v48 = vpop.eup %2566  ;;  %2570 = vrcp.f32 %v459_v47 }
 0x290   :  { %v460_v49 = vadd.f32 1.0, %v2567_v48  ;;  %2572 = vtanh.f32 %v450_v40  ;;  %v2569_v51 = vpop.eup %2568 }
 0x292   :  { %2574 = vrcp.f32 %v460_v49 }
 0x299   :  { %v2571_v52 = vpop.eup %2570 }
 0x29a   :  { %v465_v53 = vsel %vm3125_vm13, %v2569_v51, %v2571_v52  ;;  %v2573_v54 = vpop.eup %2572 }
 0x29b   :  { %471 = vrot.lane.b32.xlu0 %v465_v53, %s2870_s7  ;;  %v467_v63 = vmul.f32 0.0, %v465_v53 }
 0x29c   :  { %v2575_v55 = vpop.eup %2574 }
 0x29d   :  { %v466_v56 = vsel %vm3125_vm13, %v2573_v54, %v2575_v55 }
 0x29e   :  { %473 = vrot.lane.b32.xlu1 %v466_v56, %s2870_s7  ;;  %v468_v5 = vmul.f32 0.0, %v466_v56 }
 0x30d   :  { %v472_v59 = vpop.permute.xlu0 %471 }
 0x30e   :  { %v477_v17 = vmul.f32 %v472_v59, %v465_v53 }
 0x310   :  { %481 = vrot.lane.b32.xlu0 %v477_v17, %s2874_s4  ;;  %v474_v61 = vpop.permute.xlu1 %473 }
 0x311   :  { %v478_v62 = vmul.f32 %v474_v61, %v466_v56 }
 0x313   :  { %483 = vrot.lane.b32.xlu1 %v478_v62, %s2874_s4 }
 0x382   :  { %v482_v1 = vpop.permute.xlu0 %481 }
 0x383   :  { %v487_v3 = vadd.f32 %v482_v1, %v467_v63 }
 0x385   :  { %2576 = vtanh.f32 %v487_v3  ;;  %v484_v7 = vpop.permute.xlu1 %483 }
 0x386   :  { %v488_v9 = vadd.f32 %v484_v7, %v468_v5 }
 0x388   :  { %2578 = vtanh.f32 %v488_v9 }
 0x38f   :  { %v2577_v11 = vpop.eup %2576 }
 0x390   :  { %493 = vrot.lane.b32.xlu0 %v2577_v11, %s2870_s7 }
 0x392   :  { %v2579_v13 = vpop.eup %2578 }
 0x393   :  { %495 = vrot.lane.b32.xlu1 %v2579_v13, %s2870_s7 }
 0x402   :  { %v494_v15 = vpop.permute.xlu0 %493 }
 0x403   :  { %v499_v20 = vmul.f32 %v494_v15, %v465_v53 }
 0x405   :  { %v496_v18 = vpop.permute.xlu1 %495 }
 0x406   :  { %v500_v23 = vmul.f32 %v496_v18, %v466_v56 }
 0x408   :  { %v3139_v25 = vpack.c.bf16 %v500_v23, %v499_v20 }
 0x40a   :  { %503 = vrot.lane.b32.xlu0 %v3139_v25, %s2874_s4 }
 0x47c   :  { %v504_v27 = vpop.permute.xlu0 %503 }
 0x47d   :  { %507 = vst.msk [vmem:[#allocation3] sm:$0xf] %vm506_vm14, %v504_v27  ;;  %2408 = vmatmul.mubr.msk.bf16.vlgmr.msra.gmra.mrb[8].mxu0 %vm277_vm10, %v504_v27 }
 0x47e   :  { %738 = vmatpush1.bf16.msra.mxu0 %v3048_v42  ;;  %769 = vmatprep.mubr.bf16.mxu0 %v2872_v0 }
 0x47f   :  { %739 = vmatprep.subr.bf16.mxu0 %v3055_v43 }
 0x482   :  { %740 = vmatpush1.bf16.msra.mxu0 %v3061_v44 }
 0x483   :  { %956 = vmatprep.subr.bf16.mxu0 %v3042_v41 }
 0x550   :  { %v550_v29 = vpop.f32.mrb[8].mxu0 }
 0x551   :  { %v558_v31 = vadd.f32 %v550_v29, %v3097_v4  ;;  %v552_v32 = vpop.f32.mrb[9].mxu0 }
 0x552   :  { %v553_v33 = vpop.f32.mrb[10].mxu0 }
 0x553   :  { %v2409_v34 = vmul.f32 -1.442695, %v558_v31  ;;  %v554_v35 = vpop.f32.mrb[11].mxu0 }
 0x554   :  { %v560_v36 = vadd.f32 %v554_v35, %v3119_v28 }
 0x555   :  { %2580 = vpow2.f32 %v2409_v34 }
 0x556   :  { %v2410_v37 = vmul.f32 -1.442695, %v560_v36 }
 0x558   :  { %2582 = vpow2.f32 %v2410_v37 }
 0x559   :  { %2584 = vtanh.f32 %v558_v31 }
 0x55f   :  { %v2581_v38 = vpop.eup %2580 }
 0x560   :  { %v569_v39 = vadd.f32 1.0, %v2581_v38 }
 0x562   :  { %v2583_v40 = vpop.eup %2582  ;;  %2586 = vrcp.f32 %v569_v39 }
 0x563   :  { %v570_v45 = vadd.f32 1.0, %v2583_v40  ;;  %2588 = vtanh.f32 %v560_v36  ;;  %v2585_v46 = vpop.eup %2584 }
 0x565   :  { %2590 = vrcp.f32 %v570_v45 }
 0x56c   :  { %v2587_v47 = vpop.eup %2586 }
 0x56d   :  { %v575_v4 = vsel %vm3125_vm13, %v2585_v46, %v2587_v47  ;;  %v2589_v48 = vpop.eup %2588 }
 0x56e   :  { %581 = vrot.lane.b32.xlu1 %v575_v4, %s2870_s7  ;;  %v577_v55 = vmul.f32 %v575_v4, %v487_v3 }
 0x56f   :  { %v2591_v28 = vpop.eup %2590 }
 0x570   :  { %v576_v49 = vsel %vm3125_vm13, %v2589_v48, %v2591_v28 }
 0x571   :  { %583 = vrot.lane.b32.xlu0 %v576_v49, %s2870_s7  ;;  %v578_v17 = vmul.f32 %v576_v49, %v488_v9 }
 0x5e0   :  { %v582_v51 = vpop.permute.xlu1 %581 }
 0x5e1   :  { %v587_v52 = vmul.f32 %v582_v51, %v575_v4 }
 0x5e3   :  { %591 = vrot.lane.b32.xlu1 %v587_v52, %s2874_s4  ;;  %v584_v53 = vpop.permute.xlu0 %583 }
 0x5e4   :  { %v588_v54 = vmul.f32 %v584_v53, %v576_v49 }
 0x5e6   :  { %593 = vrot.lane.b32.xlu0 %v588_v54, %s2874_s4 }
 0x655   :  { %v592_v56 = vpop.permute.xlu1 %591 }
 0x656   :  { %v597_v59 = vadd.f32 %v592_v56, %v577_v55 }
 0x658   :  { %2592 = vtanh.f32 %v597_v59  ;;  %v594_v61 = vpop.permute.xlu0 %593 }
 0x659   :  { %v598_v62 = vadd.f32 %v594_v61, %v578_v17 }
 0x65b   :  { %2594 = vtanh.f32 %v598_v62 }
 0x662   :  { %v2593_v63 = vpop.eup %2592 }
 0x663   :  { %603 = vrot.lane.b32.xlu1 %v2593_v63, %s2870_s7 }
 0x665   :  { %v2595_v1 = vpop.eup %2594 }
 0x666   :  { %605 = vrot.lane.b32.xlu0 %v2595_v1, %s2870_s7 }
 0x6d5   :  { %v604_v5 = vpop.permute.xlu1 %603 }
 0x6d6   :  { %v609_v11 = vmul.f32 %v604_v5, %v575_v4 }
 0x6d8   :  { %v606_v7 = vpop.permute.xlu0 %605 }
 0x6d9   :  { %v610_v13 = vmul.f32 %v606_v7, %v576_v49 }
 0x6db   :  { %v3162_v15 = vpack.c.bf16 %v610_v13, %v609_v11 }
 0x6dd   :  { %624 = vrot.lane.b32.xlu1 %v3162_v15, %s2874_s4 }
 0x74f   :  { %v625_v3 = vpop.permute.xlu1 %624 }
 0x750   :  { %2411 = vmatmul.mubr.msk.bf16.vlgmr.msra.gmra.mrb[20].mxu1 %vm277_vm10, %v625_v3 }
 0x751   :  { %849 = vmatpush1.bf16.msra.mxu1 %v3048_v42  ;;  %880 = vmatprep.mubr.bf16.mxu1 %v2872_v0 }
 0x752   :  { %850 = vmatprep.subr.bf16.mxu1 %v3055_v43 }
 0x755   :  { %851 = vmatpush1.bf16.msra.mxu1 %v3061_v44 }
 0x756   :  { %1067 = vmatprep.subr.bf16.mxu1 %v3042_v41 }
 0x823   :  { %v663_v9 = vpop.f32.mrb[20].mxu1 }
 0x824   :  { %v671_v18 = vadd.f32 %v663_v9, %v3101_v8  ;;  %v665_v20 = vpop.f32.mrb[21].mxu1 }
 0x825   :  { %v666_v23 = vpop.f32.mrb[22].mxu1 }
 0x826   :  { %v2412_v27 = vmul.f32 -1.442695, %v671_v18  ;;  %v667_v29 = vpop.f32.mrb[23].mxu1 }
 0x827   :  { %v673_v31 = vadd.f32 %v667_v29, %v3115_v24 }
 0x828   :  { %2596 = vpow2.f32 %v2412_v27 }
 0x829   :  { %v2413_v32 = vmul.f32 -1.442695, %v673_v31 }
 0x82b   :  { %2598 = vpow2.f32 %v2413_v32 }
 0x82c   :  { %2600 = vtanh.f32 %v671_v18 }
 0x832   :  { %v2597_v33 = vpop.eup %2596 }
 0x833   :  { %v682_v34 = vadd.f32 1.0, %v2597_v33 }
 0x835   :  { %v2599_v35 = vpop.eup %2598  ;;  %2602 = vrcp.f32 %v682_v34 }
 0x836   :  { %v683_v36 = vadd.f32 1.0, %v2599_v35  ;;  %2604 = vtanh.f32 %v673_v31  ;;  %v2601_v37 = vpop.eup %2600 }
 0x838   :  { %2606 = vrcp.f32 %v683_v36 }
 0x83f   :  { %v2603_v38 = vpop.eup %2602 }
 0x840   :  { %v688_v8 = vsel %vm3125_vm13, %v2601_v37, %v2603_v38  ;;  %v2605_v39 = vpop.eup %2604 }
 0x841   :  { %694 = vrot.lane.b32.xlu0 %v688_v8, %s2870_s7  ;;  %v690_v48 = vmul.f32 %v688_v8, %v597_v59 }
 0x842   :  { %v2607_v24 = vpop.eup %2606 }
 0x843   :  { %v689_v40 = vsel %vm3125_vm13, %v2605_v39, %v2607_v24 }
 0x844   :  { %696 = vrot.lane.b32.xlu1 %v689_v40, %s2870_s7  ;;  %v691_v51 = vmul.f32 %v689_v40, %v598_v62 }
 0x8b3   :  { %v695_v45 = vpop.permute.xlu0 %694 }
 0x8b4   :  { %v700_v46 = vmul.f32 %v695_v45, %v688_v8 }
 0x8b6   :  { %704 = vrot.lane.b32.xlu0 %v700_v46, %s2874_s4  ;;  %v697_v47 = vpop.permute.xlu1 %696 }
 0x8b7   :  { %v701_v4 = vmul.f32 %v697_v47, %v689_v40 }
 0x8b9   :  { %706 = vrot.lane.b32.xlu1 %v701_v4, %s2874_s4 }
 0x928   :  { %v705_v28 = vpop.permute.xlu0 %704 }
 0x929   :  { %v710_v49 = vadd.f32 %v705_v28, %v690_v48 }
 0x92b   :  { %2608 = vtanh.f32 %v710_v49  ;;  %v707_v52 = vpop.permute.xlu1 %706 }
 0x92c   :  { %v711_v53 = vadd.f32 %v707_v52, %v691_v51 }
 0x92e   :  { %2610 = vtanh.f32 %v711_v53 }
 0x935   :  { %v2609_v54 = vpop.eup %2608 }
 0x936   :  { %716 = vrot.lane.b32.xlu0 %v2609_v54, %s2870_s7 }
 0x938   :  { %v2611_v55 = vpop.eup %2610 }
 0x939   :  { %718 = vrot.lane.b32.xlu1 %v2611_v55, %s2870_s7 }
 0x9a8   :  { %v717_v56 = vpop.permute.xlu0 %716 }
 0x9a9   :  { %v722_v61 = vmul.f32 %v717_v56, %v688_v8 }
 0x9ab   :  { %v719_v17 = vpop.permute.xlu1 %718 }
 0x9ac   :  { %v723_v63 = vmul.f32 %v719_v17, %v689_v40 }
 0x9ae   :  { %v3184_v1 = vpack.c.bf16 %v723_v63, %v722_v61 }
 0x9b0   :  { %726 = vrot.lane.b32.xlu0 %v3184_v1, %s2874_s4 }
 0xa22   :  { %v727_v59 = vpop.permute.xlu0 %726 }
 0xa23   :  { %729 = vst.msk [vmem:[#allocation3 + $0x8] sm:$0xf] %vm506_vm14, %v727_v59  ;;  %2414 = vmatmul.mubr.msk.bf16.vlgmr.msra.gmra.mrb[12].mxu0 %vm277_vm10, %v727_v59 }
 0xa24   :  { %957 = vmatpush1.bf16.msra.mxu0 %v3048_v42  ;;  %988 = vmatprep.mubr.bf16.mxu0 %v2872_v0 }
 0xa25   :  { %958 = vmatprep.subr.bf16.mxu0 %v3055_v43 }
 0xa28   :  { %959 = vmatpush1.bf16.msra.mxu0 %v3061_v44 }
 0xa29   :  { %1175 = vmatprep.subr.bf16.mxu0 %v3042_v41 }
 0xaf6   :  { %v771_v62 = vpop.f32.mrb[12].mxu0 }
 0xaf7   :  { %v779_v5 = vadd.f32 %v771_v62, %v3105_v12  ;;  %v773_v7 = vpop.f32.mrb[13].mxu0 }
 0xaf8   :  { %v774_v11 = vpop.f32.mrb[14].mxu0 }
 0xaf9   :  { %v2415_v13 = vmul.f32 -1.442695, %v779_v5  ;;  %v775_v3 = vpop.f32.mrb[15].mxu0 }
 0xafa   :  { %v781_v9 = vadd.f32 %v775_v3, %v3111_v19 }
 0xafb   :  { %2612 = vpow2.f32 %v2415_v13 }
 0xafc   :  { %v2416_v18 = vmul.f32 -1.442695, %v781_v9 }
 0xafe   :  { %2614 = vpow2.f32 %v2416_v18 }
 0xaff   :  { %2616 = vtanh.f32 %v779_v5 }
 0xb05   :  { %v2613_v20 = vpop.eup %2612 }
 0xb06   :  { %v790_v23 = vadd.f32 1.0, %v2613_v20 }
 0xb08   :  { %v2615_v27 = vpop.eup %2614  ;;  %2618 = vrcp.f32 %v790_v23 }
 0xb09   :  { %v791_v29 = vadd.f32 1.0, %v2615_v27  ;;  %2620 = vtanh.f32 %v781_v9  ;;  %v2617_v41 = vpop.eup %2616 }
 0xb0b   :  { %2622 = vrcp.f32 %v791_v29 }
 0xb12   :  { %v2619_v31 = vpop.eup %2618 }
 0xb13   :  { %v796_v12 = vsel %vm3125_vm13, %v2617_v41, %v2619_v31  ;;  %v2621_v32 = vpop.eup %2620 }
 0xb14   :  { %802 = vrot.lane.b32.xlu1 %v796_v12, %s2870_s7  ;;  %v798_v38 = vmul.f32 %v796_v12, %v710_v49 }
 0xb15   :  { %v2623_v19 = vpop.eup %2622 }
 0xb16   :  { %v797_v33 = vsel %vm3125_vm13, %v2621_v32, %v2623_v19 }
 0xb17   :  { %804 = vrot.lane.b32.xlu0 %v797_v33, %s2870_s7  ;;  %v799_v24 = vmul.f32 %v797_v33, %v711_v53 }
 0xb86   :  { %v803_v34 = vpop.permute.xlu1 %802 }
 0xb87   :  { %v808_v35 = vmul.f32 %v803_v34, %v796_v12 }
 0xb89   :  { %812 = vrot.lane.b32.xlu1 %v808_v35, %s2874_s4  ;;  %v805_v36 = vpop.permute.xlu0 %804 }
 0xb8a   :  { %v809_v37 = vmul.f32 %v805_v36, %v797_v33 }
 0xb8c   :  { %814 = vrot.lane.b32.xlu0 %v809_v37, %s2874_s4 }
 0xbfb   :  { %v813_v8 = vpop.permute.xlu1 %812 }
 0xbfc   :  { %v818_v39 = vadd.f32 %v813_v8, %v798_v38 }
 0xbfe   :  { %2624 = vtanh.f32 %v818_v39  ;;  %v815_v40 = vpop.permute.xlu0 %814 }
 0xbff   :  { %v819_v45 = vadd.f32 %v815_v40, %v799_v24 }
 0xc01   :  { %2626 = vtanh.f32 %v819_v45 }
 0xc08   :  { %v2625_v46 = vpop.eup %2624 }
 0xc09   :  { %824 = vrot.lane.b32.xlu1 %v2625_v46, %s2870_s7 }
 0xc0b   :  { %v2627_v47 = vpop.eup %2626 }
 0xc0c   :  { %826 = vrot.lane.b32.xlu0 %v2627_v47, %s2870_s7 }
 0xc7b   :  { %v825_v4 = vpop.permute.xlu1 %824 }
 0xc7c   :  { %v830_v28 = vmul.f32 %v825_v4, %v796_v12 }
 0xc7e   :  { %v827_v48 = vpop.permute.xlu0 %826 }
 0xc7f   :  { %v831_v51 = vmul.f32 %v827_v48, %v797_v33 }
 0xc81   :  { %v3207_v52 = vpack.c.bf16 %v831_v51, %v830_v28 }
 0xc83   :  { %843 = vrot.lane.b32.xlu1 %v3207_v52, %s2874_s4 }
 0xcf5   :  { %v844_v49 = vpop.permute.xlu1 %843 }
 0xcf6   :  { %2417 = vmatmul.mubr.msk.bf16.vlgmr.msra.gmra.mrb[24].mxu1 %vm277_vm10, %v844_v49 }
 0xcf7   :  { %1068 = vmatpush1.bf16.msra.mxu1 %v3048_v42  ;;  %1099 = vmatprep.mubr.bf16.mxu1 %v2872_v0 }
 0xcf8   :  { %1069 = vmatprep.subr.bf16.mxu1 %v3055_v43 }
 0xcfb   :  { %1070 = vmatpush1.bf16.msra.mxu1 %v3061_v44 }
 0xdc9   :  { %v882_v53 = vpop.f32.mrb[24].mxu1 }
 0xdca   :  { %v890_v54 = vadd.f32 %v882_v53, %v3109_v16  ;;  %v884_v55 = vpop.f32.mrb[25].mxu1 }
 0xdcb   :  { %v885_v56 = vpop.f32.mrb[26].mxu1 }
 0xdcc   :  { %v2418_v17 = vmul.f32 -1.442695, %v890_v54  ;;  %v886_v61 = vpop.f32.mrb[27].mxu1 }
 0xdcd   :  { %v892_v63 = vadd.f32 %v886_v61, %v3107_v14 }
 0xdce   :  { %2628 = vpow2.f32 %v2418_v17 }
 0xdcf   :  { %v2419_v59 = vmul.f32 -1.442695, %v892_v63 }
 0xdd1   :  { %2630 = vpow2.f32 %v2419_v59 }
 0xdd2   :  { %2632 = vtanh.f32 %v890_v54 }
 0xdd8   :  { %v2629_v62 = vpop.eup %2628 }
 0xdd9   :  { %v901_v5 = vadd.f32 1.0, %v2629_v62 }
 0xddb   :  { %v2631_v7 = vpop.eup %2630  ;;  %2634 = vrcp.f32 %v901_v5 }
 0xddc   :  { %v902_v11 = vadd.f32 1.0, %v2631_v7  ;;  %2636 = vtanh.f32 %v892_v63  ;;  %v2633_v13 = vpop.eup %2632 }
 0xdde   :  { %2638 = vrcp.f32 %v902_v11 }
 0xde5   :  { %v2635_v3 = vpop.eup %2634 }
 0xde6   :  { %v907_v16 = vsel %vm3125_vm13, %v2633_v13, %v2635_v3  ;;  %v2637_v9 = vpop.eup %2636 }
 0xde7   :  { %913 = vrot.lane.b32.xlu0 %v907_v16, %s2870_s7  ;;  %v909_v41 = vmul.f32 %v907_v16, %v818_v39 }
 0xde8   :  { %v2639_v14 = vpop.eup %2638 }
 0xde9   :  { %v908_v18 = vsel %vm3125_vm13, %v2637_v9, %v2639_v14 }
 0xdea   :  { %915 = vrot.lane.b32.xlu1 %v908_v18, %s2870_s7  ;;  %v910_v32 = vmul.f32 %v908_v18, %v819_v45 }
 0xe59   :  { %v914_v20 = vpop.permute.xlu0 %913 }
 0xe5a   :  { %v919_v23 = vmul.f32 %v914_v20, %v907_v16 }
 0xe5c   :  { %v916_v27 = vpop.permute.xlu1 %915  ;;  %923 = vrot.lane.b32.xlu0 %v919_v23, %s2874_s4 }
 0xe5d   :  { %v920_v29 = vmul.f32 %v916_v27, %v908_v18 }
 0xe5f   :  { %925 = vrot.lane.b32.xlu1 %v920_v29, %s2874_s4 }
 0xece   :  { %v924_v31 = vpop.permute.xlu0 %923 }
 0xecf   :  { %v929_v12 = vadd.f32 %v924_v31, %v909_v41 }
 0xed1   :  { %2640 = vtanh.f32 %v929_v12  ;;  %v926_v19 = vpop.permute.xlu1 %925 }
 0xed2   :  { %v930_v33 = vadd.f32 %v926_v19, %v910_v32 }
 0xed4   :  { %2642 = vtanh.f32 %v930_v33 }
 0xedb   :  { %v2641_v34 = vpop.eup %2640 }
 0xedc   :  { %935 = vrot.lane.b32.xlu0 %v2641_v34, %s2870_s7 }
 0xede   :  { %v2643_v35 = vpop.eup %2642 }
 0xedf   :  { %937 = vrot.lane.b32.xlu1 %v2643_v35, %s2870_s7 }
 0xf4e   :  { %v936_v36 = vpop.permute.xlu0 %935 }
 0xf4f   :  { %v941_v38 = vmul.f32 %v936_v36, %v907_v16 }
 0xf51   :  { %v938_v37 = vpop.permute.xlu1 %937 }
 0xf52   :  { %v942_v8 = vmul.f32 %v938_v37, %v908_v18 }
 0xf54   :  { %v3228_v24 = vpack.c.bf16 %v942_v8, %v941_v38 }
 0xf56   :  { %945 = vrot.lane.b32.xlu0 %v3228_v24, %s2874_s4 }
 0xfc8   :  { %v3232_v39 = vpop.permute.xlu0 %945 }
 0xfc9   :  { %2420 = vmatmul.mubr.msk.bf16.vlgmr.msra.gmra.mrb[16].mxu0 %vm277_vm10, %v3232_v39 }
 0xfca   :  { %1176 = vmatpush1.bf16.msra.mxu0 %v3048_v42  ;;  %1207 = vmatprep.mubr.bf16.mxu0 %v2872_v0 }
 0xfcb   :  { %1177 = vmatprep.subr.bf16.mxu0 %v3055_v43 }
 0xfce   :  { %1178 = vmatpush1.bf16.msra.mxu0 %v3061_v44 }
0x109c   :  { %v990_v40 = vpop.f32.mrb[16].mxu0 }
0x109d   :  { %v998_v45 = vadd.f32 %v990_v40, %v3113_v21  ;;  %v992_v46 = vpop.f32.mrb[17].mxu0 }
0x109e   :  { %v993_v47 = vpop.f32.mrb[18].mxu0 }
0x109f   :  { %v2421_v4 = vmul.f32 -1.442695, %v998_v45  ;;  %v994_v48 = vpop.f32.mrb[19].mxu0 }
0x10a0   :  { %v1000_v28 = vadd.f32 %v994_v48, %v3103_v10 }
0x10a1   :  { %2644 = vpow2.f32 %v2421_v4 }
0x10a2   :  { %v2422_v51 = vmul.f32 -1.442695, %v1000_v28 }
0x10a4   :  { %2646 = vpow2.f32 %v2422_v51 }
0x10a5   :  { %2648 = vtanh.f32 %v998_v45 }
0x10ab   :  { %v2645_v49 = vpop.eup %2644 }
0x10ac   :  { %v1009_v42 = vadd.f32 1.0, %v2645_v49 }
0x10ae   :  { %v2647_v53 = vpop.eup %2646  ;;  %2650 = vrcp.f32 %v1009_v42 }
0x10af   :  { %v1010_v43 = vadd.f32 1.0, %v2647_v53  ;;  %2652 = vtanh.f32 %v1000_v28  ;;  %v2649_v44 = vpop.eup %2648 }
0x10b1   :  { %2654 = vrcp.f32 %v1010_v43 }
0x10b8   :  { %v2651_v54 = vpop.eup %2650 }
0x10b9   :  { %v1015_v21 = vsel %vm3125_vm13, %v2649_v44, %v2651_v54  ;;  %v2653_v55 = vpop.eup %2652 }
0x10ba   :  { %1021 = vrot.lane.b32.xlu1 %v1015_v21, %s2870_s7  ;;  %v1017_v62 = vmul.f32 %v1015_v21, %v929_v12 }
0x10bb   :  { %v2655_v10 = vpop.eup %2654 }
0x10bc   :  { %v1016_v56 = vsel %vm3125_vm13, %v2653_v55, %v2655_v10 }
0x10bd   :  { %1023 = vrot.lane.b32.xlu0 %v1016_v56, %s2870_s7  ;;  %v1018_v11 = vmul.f32 %v1016_v56, %v930_v33 }
0x112c   :  { %v1022_v17 = vpop.permute.xlu1 %1021 }
0x112d   :  { %v1027_v61 = vmul.f32 %v1022_v17, %v1015_v21 }
0x112f   :  { %1031 = vrot.lane.b32.xlu1 %v1027_v61, %s2874_s4  ;;  %v1024_v63 = vpop.permute.xlu0 %1023 }
0x1130   :  { %v1028_v59 = vmul.f32 %v1024_v63, %v1016_v56 }
0x1132   :  { %1033 = vrot.lane.b32.xlu0 %v1028_v59, %s2874_s4 }
0x11a1   :  { %v1032_v5 = vpop.permute.xlu1 %1031 }
0x11a2   :  { %v1037_v7 = vadd.f32 %v1032_v5, %v1017_v62 }
0x11a4   :  { %2656 = vtanh.f32 %v1037_v7  ;;  %v1034_v13 = vpop.permute.xlu0 %1033 }
0x11a5   :  { %v1038_v3 = vadd.f32 %v1034_v13, %v1018_v11 }
0x11a7   :  { %2658 = vtanh.f32 %v1038_v3 }
0x11ae   :  { %v2657_v16 = vpop.eup %2656 }
0x11af   :  { %1043 = vrot.lane.b32.xlu1 %v2657_v16, %s2870_s7 }
0x11b1   :  { %v2659_v9 = vpop.eup %2658 }
0x11b2   :  { %1045 = vrot.lane.b32.xlu0 %v2659_v9, %s2870_s7 }
0x1221   :  { %v1044_v14 = vpop.permute.xlu1 %1043 }
0x1222   :  { %v1049_v20 = vmul.f32 %v1044_v14, %v1015_v21 }
0x1224   :  { %v1046_v18 = vpop.permute.xlu0 %1045 }
0x1225   :  { %v1050_v23 = vmul.f32 %v1046_v18, %v1016_v56 }
0x1227   :  { %v3252_v27 = vpack.c.bf16 %v1050_v23, %v1049_v20 }
0x1229   :  { %1062 = vrot.lane.b32.xlu1 %v3252_v27, %s2874_s4 }
0x129b   :  { %v1063_v29 = vpop.permute.xlu1 %1062 }
0x129c   :  { %2423 = vmatmul.mubr.msk.bf16.vlgmr.msra.gmra.mrb[28].mxu1 %vm277_vm10, %v1063_v29 }
0x129d   :  { %1390 = vmatprep.mubr.bf16.mxu1 %v2872_v0 }
0x136f   :  { %v1101_v41 = vpop.f32.mrb[28].mxu1 }
0x1370   :  { %v1109_v31 = vadd.f32 %v1101_v41, %v3117_v26  ;;  %v1103_v12 = vpop.f32.mrb[29].mxu1 }
0x1371   :  { %v1104_v32 = vpop.f32.mrb[30].mxu1 }
0x1372   :  { %v2424_v19 = vmul.f32 -1.442695, %v1109_v31  ;;  %v1105_v33 = vpop.f32.mrb[31].mxu1 }
0x1373   :  { %v1111_v34 = vadd.f32 %v1105_v33, %v3099_v6 }
0x1374   :  { %2660 = vpow2.f32 %v2424_v19 }
0x1375   :  { %v2425_v35 = vmul.f32 -1.442695, %v1111_v34 }
0x1377   :  { %2662 = vpow2.f32 %v2425_v35 }
0x1378   :  { %2664 = vtanh.f32 %v1109_v31 }
0x137e   :  { %v2661_v36 = vpop.eup %2660 }
0x137f   :  { %v1120_v37 = vadd.f32 1.0, %v2661_v36 }
0x1381   :  { %v2663_v38 = vpop.eup %2662  ;;  %2666 = vrcp.f32 %v1120_v37 }
0x1382   :  { %v1121_v8 = vadd.f32 1.0, %v2663_v38  ;;  %2668 = vtanh.f32 %v1111_v34  ;;  %v2665_v40 = vpop.eup %2664 }
0x1384   :  { %2670 = vrcp.f32 %v1121_v8 }
0x138b   :  { %v2667_v45 = vpop.eup %2666 }
0x138c   :  { %v1126_v26 = vsel %vm3125_vm13, %v2665_v40, %v2667_v45  ;;  %v2669_v46 = vpop.eup %2668 }
0x138d   :  { %1132 = vrot.lane.b32.xlu0 %v1126_v26, %s2870_s7  ;;  %v1128_v49 = vmul.f32 %v1126_v26, %v1037_v7 }
0x138e   :  { %v2671_v6 = vpop.eup %2670 }
0x138f   :  { %v1127_v47 = vsel %vm3125_vm13, %v2669_v46, %v2671_v6  ;;  %v613_v46 = vrot.slane %v3162_v15, 4  ;;  %v834_v6 = vrot.slane %v3207_v52, 4  ;;  %v2545_v52 = vld [vmem:[%s3574_s5 + $0x10] ss:$8 sps:$4 sm:$0xff]  }
0x1390   :  { %1134 = vrot.lane.b32.xlu1 %v1127_v47, %s2870_s7  ;;  %v1129_v43 = vmul.f32 %v1127_v47, %v1038_v3 }
0x13ff   :  { %v1133_v4 = vpop.permute.xlu0 %1132 }
0x1400   :  { %v1138_v48 = vmul.f32 %v1133_v4, %v1126_v26  ;;  %v2544_v4 = vld [vmem:[%s3574_s5 + $0x4] ss:$8 sps:$4 sm:$0xff]  }
0x1401   :  { %1358 = vmatprep.subr.bf16.mxu1 %v2544_v4 }
0x1402   :  { %1142 = vrot.lane.b32.xlu0 %v1138_v48, %s2874_s4  ;;  %v1135_v28 = vpop.permute.xlu1 %1134  ;;  %v1053_v48 = vrot.slane %v3252_v27, 4  ;;  %v2550_v27 = vld [vmem:[%s3574_s5 + $0x24] ss:$8 sps:$4 sm:$0xff]  }
0x1403   :  { %v1139_v51 = vmul.f32 %v1135_v28, %v1127_v47  ;;  %v2547_v28 = vld [vmem:[%s3574_s5 + $0x14] ss:$8 sps:$4 sm:$0xff]  }
0x1405   :  { %1144 = vrot.lane.b32.xlu1 %v1139_v51, %s2874_s4  ;;  %v2548_v51 = vld [vmem:[%s3574_s5 + $0x20] ss:$8 sps:$4 sm:$0xff]  }
0x1474   :  { %v1143_v42 = vpop.permute.xlu0 %1142 }
0x1475   :  { %v1148_v53 = vadd.f32 %v1143_v42, %v1128_v49  ;;  %v3321_v49 = vld [vmem:[%s3575_s6 + $0x4] ss:$8 sps:$4 sm:$0xff]   ;;  %v3326_v42 = vld [vmem:[%s3575_s6] ss:$8 sps:$4 sm:$0xff]  }
0x1476   :  { %1471 = vmatprep.subr.bf16.mxu0 %v3321_v49 }
0x1477   :  { %2672 = vtanh.f32 %v1148_v53  ;;  %v1145_v44 = vpop.permute.xlu1 %1144 }
0x1478   :  { %v1149_v54 = vadd.f32 %v1145_v44, %v1129_v43  ;;  %v2554_v43 = vld [vmem:[%s3574_s5 + $0x30] ss:$8 sps:$4 sm:$0xff]   ;;  %v3339_v44 = vld [vmem:[%s3575_s6 + $0x14] ss:$8 sps:$4 sm:$0xff]  }
0x147a   :  { %2674 = vtanh.f32 %v1149_v54 }
0x1481   :  { %v2673_v21 = vpop.eup %2672 }
0x1482   :  { %1154 = vrot.lane.b32.xlu0 %v2673_v21, %s2870_s7 }
0x1484   :  { %v2675_v55 = vpop.eup %2674 }
0x1485   :  { %1156 = vrot.lane.b32.xlu1 %v2675_v55, %s2870_s7 }
0x14f4   :  { %v1155_v10 = vpop.permute.xlu0 %1154 }
0x14f5   :  { %v1160_v17 = vmul.f32 %v1155_v10, %v1126_v26 }
0x14f7   :  { %v1157_v56 = vpop.permute.xlu1 %1156 }
0x14f8   :  { %v1161_v61 = vmul.f32 %v1157_v56, %v1127_v47  ;;  %v2542_v47 = vld [vmem:[%s3574_s5] ss:$8 sps:$4 sm:$0xff]  }
0x14f9   :  { %1359 = vmatpush1.bf16.msra.mxu1 %v2542_v47 }
0x14fa   :  { %v1162_v63 = vpack.c.bf16 %v1161_v61, %v1160_v17  ;;  %1360 = vmatprep.subr.bf16.mxu1 %v2547_v28 }
0x14fc   :  { %1164 = vrot.lane.b32.xlu0 %v1162_v63, %s2874_s4 }
0x14fd   :  { %1361 = vmatpush1.bf16.msra.mxu1 %v2545_v52 }
0x14fe   :  { %1362 = vmatprep.subr.bf16.mxu1 %v2550_v27 }
0x1501   :  { %1363 = vmatpush1.bf16.msra.mxu1 %v2548_v51 }
0x156e   :  { %v3271_v59 = vpop.permute.xlu0 %1164 }
0x156f   :  { %2426 = vmatmul.mubr.msk.bf16.vlgmr.msra.gmra.mrb[20].mxu0 %vm277_vm10, %v3271_v59 }
0x1570   :  { %1503 = vmatprep.mubr.bf16.mxu0 %v2872_v0  ;;  %1472 = vmatpush1.bf16.msra.mxu0 %v3326_v42 }
0x1571   :  { %1473 = vmatprep.subr.bf16.mxu0 %v3339_v44 }
0x1642   :  { %v1209_v62 = vpop.f32.mrb[20].mxu0 }
0x1643   :  { %v1217_v5 = vadd.f32 %v1209_v62, %v3121_v30  ;;  %v1211_v7 = vpop.f32.mrb[21].mxu0 }
0x1644   :  { %v1212_v11 = vpop.f32.mrb[22].mxu0 }
0x1645   :  { %v2427_v13 = vmul.f32 -1.442695, %v1217_v5  ;;  %v1213_v3 = vpop.f32.mrb[23].mxu0 }
0x1646   :  { %v1219_v16 = vadd.f32 %v1213_v3, %v3095_v2 }
0x1647   :  { %2676 = vpow2.f32 %v2427_v13 }
0x1648   :  { %v2428_v9 = vmul.f32 -1.442695, %v1219_v16 }
0x164a   :  { %2678 = vpow2.f32 %v2428_v9 }
0x164b   :  { %2680 = vtanh.f32 %v1217_v5 }
0x1651   :  { %v2677_v14 = vpop.eup %2676 }
0x1652   :  { %v1228_v18 = vadd.f32 1.0, %v2677_v14 }
0x1654   :  { %v2679_v20 = vpop.eup %2678  ;;  %2682 = vrcp.f32 %v1228_v18 }
0x1655   :  { %v1229_v23 = vadd.f32 1.0, %v2679_v20  ;;  %2684 = vtanh.f32 %v1219_v16  ;;  %v2681_v29 = vpop.eup %2680 }
0x1657   :  { %2686 = vrcp.f32 %v1229_v23 }
0x165e   :  { %v2683_v41 = vpop.eup %2682 }
0x165f   :  { %v1234_v30 = vsel %vm3125_vm13, %v2681_v29, %v2683_v41  ;;  %v2685_v31 = vpop.eup %2684 }
0x1660   :  { %1240 = vrot.lane.b32.xlu1 %v1234_v30, %s2870_s7  ;;  %v1236_v35 = vmul.f32 %v1234_v30, %v1148_v53 }
0x1661   :  { %v2687_v2 = vpop.eup %2686 }
0x1662   :  { %v1235_v12 = vsel %vm3125_vm13, %v2685_v31, %v2687_v2 }
0x1663   :  { %1242 = vrot.lane.b32.xlu0 %v1235_v12, %s2870_s7  ;;  %v1237_v38 = vmul.f32 %v1235_v12, %v1149_v54  ;;  %v3344_v54 = vld [vmem:[%s3575_s6 + $0x10] ss:$8 sps:$4 sm:$0xff]  }
0x1664   :  { %1474 = vmatpush1.bf16.msra.mxu0 %v3344_v54 }
0x1665   :  { %1573 = vmatprep.subr.bf16.mxu0 %v3321_v49 }
0x1667   :  { %1504 = vmatmul.mubr.bf16.vlgmr.msra.gmra.mrb[24].mxu0 %v2872_v0 }
0x1668   :  { %1574 = vmatpush1.bf16.msra.mxu0 %v3326_v42  ;;  %1605 = vmatprep.mubr.bf16.mxu0 %v2872_v0 }
0x1669   :  { %1575 = vmatprep.subr.bf16.mxu0 %v3339_v44 }
0x166c   :  { %1576 = vmatpush1.bf16.msra.mxu0 %v3344_v54 }
0x166d   :  { %1675 = vmatprep.subr.bf16.mxu0 %v3321_v49 }
0x16d2   :  { %v1241_v32 = vpop.permute.xlu1 %1240 }
0x16d3   :  { %v1246_v19 = vmul.f32 %v1241_v32, %v1234_v30 }
0x16d5   :  { %1250 = vrot.lane.b32.xlu1 %v1246_v19, %s2874_s4  ;;  %v1243_v33 = vpop.permute.xlu0 %1242 }
0x16d6   :  { %v1247_v34 = vmul.f32 %v1243_v33, %v1235_v12 }
0x16d8   :  { %1252 = vrot.lane.b32.xlu0 %v1247_v34, %s2874_s4 }
0x173a   :  { %v1505_v20 = vpop.f32.mrb[24].mxu0 }
0x173b   :  { %v1507_v23 = vpop.f32.mrb[25].mxu0 }
0x173c   :  { %v1508_v29 = vpop.f32.mrb[26].mxu0 }
0x173d   :  { %v1509_v41 = vpop.f32.mrb[27].mxu0 }
0x1747   :  { %v1251_v36 = vpop.permute.xlu1 %1250 }
0x1748   :  { %v1256_v37 = vadd.f32 %v1251_v36, %v1236_v35 }
0x174a   :  { %2688 = vtanh.f32 %v1256_v37  ;;  %v1253_v8 = vpop.permute.xlu0 %1252 }
0x174b   :  { %v1257_v40 = vadd.f32 %v1253_v8, %v1237_v38 }
0x174d   :  { %2690 = vtanh.f32 %v1257_v40 }
0x1754   :  { %v2689_v45 = vpop.eup %2688 }
0x1755   :  { %1262 = vrot.lane.b32.xlu1 %v2689_v45, %s2870_s7 }
0x1757   :  { %v2691_v26 = vpop.eup %2690 }
0x1758   :  { %1264 = vrot.lane.b32.xlu0 %v2691_v26, %s2870_s7 }
0x1759   :  { %614 = vrot.lane.b32.xlu1 %v613_v46, %s2874_s4 }
0x175c   :  { %1168 = vrot.lane.b32.xlu0 %v1162_v63, %s2870_s7 }
0x1760   :  { %835 = vrot.lane.b32.xlu0 %v834_v6, %s2874_s4 }
0x1764   :  { %1058 = vrot.lane.b32.xlu0 %v1053_v48, %s2870_s7 }
0x1768   :  { %839 = vrot.lane.b32.xlu0 %v834_v6, %s2870_s7 }
0x176c   :  { %508 = vrot.lane.b32.xlu0 %v3139_v25, %s2870_s7  ;;  %v2556_v25 = vld [vmem:[%s3574_s5 + $0x34] ss:$8 sps:$4 sm:$0xff]  }
0x176d   :  { %1364 = vmatprep.subr.bf16.mxu1 %v2556_v25 }
0x176e   :  { %1365 = vmatpush1.bf16.msra.mxu1 %v2554_v43 }
0x176f   :  { %1981 = vmatprep.subr.bf16.mxu1 %v3321_v49 }
0x17c7   :  { %v1263_v53 = vpop.permute.xlu1 %1262 }
0x17c8   :  { %v1268_v55 = vmul.f32 %v1263_v53, %v1234_v30  ;;  %v1293_v30 = vld [vmem:[#allocation4] sm:$0x3] }
0x17c9   :  { %v1302_v31 = vrot.slane %v1293_v30, %v253_v58 }
0x17ca   :  { %v1265_v21 = vpop.permute.xlu0 %1264 }
0x17cb   :  { %v1269_v10 = vmul.f32 %v1265_v21, %v1235_v12  ;;  %v615_v56 = vpop.permute.xlu1 %614 }
0x17cc   :  { %618 = vst.msk [vmem:[#allocation3] sm:$0xf0] %vm617_vm15, %v615_v56 }
0x17cd   :  { %v1270_v17 = vpack.c.bf16 %v1269_v10, %v1268_v55 }
0x17ce   :  { %v1169_v61 = vpop.permute.xlu0 %1168 }
0x17cf   :  { %1171 = vst.msk [vmem:[#allocation3] sm:$0xf0] %vm511_vm0, %v1169_v61  ;;  %v1272_v63 = vrot.slane %v1270_v17, 4 }
0x17d1   :  { %1277 = vrot.lane.b32.xlu1 %v1272_v63, %s2870_s7  ;;  %1273 = vrot.lane.b32.xlu0 %v1272_v63, %s2874_s4 }
0x17d2   :  { %v836_v62 = vpop.permute.xlu0 %835 }
0x17d3   :  { %838 = vst.msk [vmem:[#allocation3 + $0x8] sm:$0xf0] %vm617_vm15, %v836_v62 }
0x17d5   :  { %949 = vrot.lane.b32.xlu1 %v3228_v24, %s2870_s7 }
0x17d6   :  { %v1059_v5 = vpop.permute.xlu0 %1058 }
0x17d7   :  { %1061 = vst.msk [vmem:[#allocation3 + $0x8] sm:$0xf] %vm622_vm1, %v1059_v5 }
0x17d9   :  { %730 = vrot.lane.b32.xlu1 %v3184_v1, %s2870_s7 }
0x17da   :  { %v840_v7 = vpop.permute.xlu0 %839 }
0x17db   :  { %842 = vst.msk [vmem:[#allocation3 + $0x10] sm:$0xf] %vm622_vm1, %v840_v7 }
0x17dc   :  { %948 = vst.msk [vmem:[#allocation3 + $0x10] sm:$0xf] %vm506_vm14, %v3232_v39 }
0x17dd   :  { %1054 = vrot.lane.b32.xlu1 %v1053_v48, %s2874_s4 }
0x17de   :  { %v509_v11 = vpop.permute.xlu0 %508 }
0x17df   :  { %512 = vst.msk [vmem:[#allocation3 + $0x18] sm:$0xf0] %vm511_vm0, %v509_v11 }
0x17e1   :  { %619 = vrot.lane.b32.xlu1 %v613_v46, %s2870_s7 }
0x1843   :  { %v1278_v24 = vpop.permute.xlu1 %1277  ;;  %v1274_v13 = vpop.permute.xlu0 %1273 }
0x1844   :  { %1280 = vst.msk [vmem:[#allocation3] sm:$0xf] %vm622_vm1, %v1278_v24 }
0x1845   :  { %1276 = vst.msk [vmem:[#allocation3 + $0x18] sm:$0xf0] %vm617_vm15, %v1274_v13 }
0x1847   :  { %v950_v1 = vpop.permute.xlu1 %949 }
0x1848   :  { %952 = vst.msk [vmem:[#allocation3 + $0x8] sm:$0xf0] %vm511_vm0, %v950_v1 }
0x184b   :  { %v731_v39 = vpop.permute.xlu1 %730  ;;  %v1281_v3 = vld [vmem:[#allocation3] sm:$0xff] }
0x184c   :  { %733 = vst.msk [vmem:[#allocation3 + $0x10] sm:$0xf0] %vm511_vm0, %v731_v39  ;;  %2437 = vmatmul.mubr.msk.bf16.vlgmr.msra.gmra.mrb[32].mxu1 %vm1345_vm2, %v1281_v3 }
0x184d   :  { %1400 = vmatprep.mubr.bf16.mxu1 %v2872_v0  ;;  %1982 = vmatpush1.bf16.msra.mxu1 %v3326_v42 }
0x184e   :  { %1983 = vmatprep.subr.bf16.mxu1 %v3339_v44 }
0x184f   :  { %v1055_v15 = vpop.permute.xlu1 %1054  ;;  %v1282_v9 = vld [vmem:[#allocation3 + $0x8] sm:$0xff] }
0x1850   :  { %1057 = vst.msk [vmem:[#allocation3 + $0x10] sm:$0xf0] %vm617_vm15, %v1055_v15 }
0x1851   :  { %1984 = vmatpush1.bf16.msra.mxu1 %v3344_v54 }
0x1852   :  { %2185 = vmatprep.subr.bf16.mxu1 %v3321_v49 }
0x1853   :  { %v620_v16 = vpop.permute.xlu1 %619 }
0x1854   :  { %623 = vst.msk [vmem:[#allocation3 + $0x18] sm:$0xf] %vm622_vm1, %v620_v16  ;;  %2438 = vmatmul.mubr.msk.bf16.gmra.mrb[36].mxu1 %vm1345_vm2, %v1282_v9 }
0x1855   :  { %1167 = vst.msk [vmem:[#allocation3 + $0x18] sm:$0xf] %vm506_vm14, %v3271_v59  ;;  %1410 = vmatprep.mubr.bf16.mxu1 %v2872_v0  ;;  %v1298_v59 = vrot.slane %v1293_v30, %v249_v60 }
0x1857   :  { %v1283_v14 = vld [vmem:[#allocation3 + $0x10] sm:$0xff] }
0x185c   :  { %2439 = vmatmul.mubr.msk.bf16.gmra.mrb[40].mxu1 %vm1345_vm2, %v1283_v14  ;;  %v1284_v18 = vld [vmem:[#allocation3 + $0x18] sm:$0xff] }
0x185d   :  { %1420 = vmatprep.mubr.bf16.mxu1 %v2872_v0 }
0x1864   :  { %2440 = vmatmul.mubr.msk.bf16.gmra.mrb[44].mxu1 %vm1345_vm2, %v1284_v18 }
0x1865   :  { %2013 = vmatprep.mubr.bf16.mxu1 %v2872_v0 }
0x191f   :  { %v1392_v2 = vpop.f32.mrb[32].mxu1 }
0x1920   :  { %v1393_v12 = vadd.f32 %v1392_v2, %v1298_v59  ;;  %v1394_v32 = vpop.f32.mrb[33].mxu1 }
0x1921   :  { %v3398_v19 = vadd.f32 %v1394_v32, %v1302_v31  ;;  %v1396_v33 = vpop.f32.mrb[34].mxu1 }
0x1922   :  { %v3400_v34 = vadd.f32 %v1396_v33, %v1298_v59  ;;  %v1513_v35 = vadd.f32 %v1505_v20, %v1393_v12  ;;  %v1398_v36 = vpop.f32.mrb[35].mxu1 }
0x1923   :  { %v3402_v37 = vadd.f32 %v1398_v36, %v1302_v31 }
0x1924   :  { %v2445_v38 = vmul.f32 -1.442695, %v1513_v35 }
0x1926   :  { %2692 = vpow2.f32 %v2445_v38 }
0x1927   :  { %v1402_v8 = vpop.f32.mrb[36].mxu1  ;;  %2694 = vtanh.f32 %v1513_v35 }
0x1928   :  { %v3404_v40 = vadd.f32 %v1402_v8, %v1298_v59  ;;  %v1404_v60 = vpop.f32.mrb[37].mxu1 }
0x1929   :  { %v3406_v57 = vadd.f32 %v1404_v60, %v1302_v31  ;;  %v1406_v58 = vpop.f32.mrb[38].mxu1 }
0x192a   :  { %v3408_v45 = vadd.f32 %v1406_v58, %v1298_v59  ;;  %v1408_v26 = vpop.f32.mrb[39].mxu1 }
0x192b   :  { %v3410_v46 = vadd.f32 %v1408_v26, %v1302_v31 }
0x192f   :  { %v1412_v6 = vpop.f32.mrb[40].mxu1 }
0x1930   :  { %v2693_v47 = vpop.eup %2692  ;;  %v3412_v4 = vadd.f32 %v1412_v6, %v1298_v59  ;;  %v1414_v48 = vpop.f32.mrb[41].mxu1 }
0x1931   :  { %v1524_v28 = vadd.f32 1.0, %v2693_v47  ;;  %v3414_v52 = vadd.f32 %v1414_v48, %v1302_v31  ;;  %v1416_v27 = vpop.f32.mrb[42].mxu1  ;;  %v2695_v62 = vpop.eup %2694 }
0x1932   :  { %v3416_v51 = vadd.f32 %v1416_v27, %v1298_v59  ;;  %v1418_v25 = vpop.f32.mrb[43].mxu1 }
0x1933   :  { %2696 = vrcp.f32 %v1524_v28  ;;  %v3418_v53 = vadd.f32 %v1418_v25, %v1302_v31 }
0x1937   :  { %v1422_v43 = vpop.f32.mrb[44].mxu1 }
0x1938   :  { %v3420_v21 = vadd.f32 %v1422_v43, %v1298_v59  ;;  %v1424_v55 = vpop.f32.mrb[45].mxu1 }
0x1939   :  { %v1425_v10 = vadd.f32 %v1424_v55, %v1302_v31  ;;  %v1426_v56 = vpop.f32.mrb[46].mxu1 }
0x193a   :  { %v3422_v17 = vadd.f32 %v1426_v56, %v1298_v59  ;;  %v1428_v61 = vpop.f32.mrb[47].mxu1 }
0x193b   :  { %v1429_v63 = vadd.f32 %v1428_v61, %v1302_v31 }
0x193d   :  { %v2697_v5 = vpop.eup %2696  ;;  %v1515_v7 = vadd.f32 %v1509_v41, %v1429_v63 }
0x193e   :  { %v1530_v11 = vsel %vm3125_vm13, %v2695_v62, %v2697_v5 }
0x193f   :  { %v2446_v24 = vmul.f32 -1.442695, %v1515_v7  ;;  %1536 = vrot.lane.b32.xlu1 %v1530_v11, %s2870_s7  ;;  %v1532_v20 = vmul.f32 0.0, %v1530_v11 }
0x1941   :  { %2698 = vpow2.f32 %v2446_v24 }
0x1942   :  { %2700 = vtanh.f32 %v1515_v7 }
0x194b   :  { %v2699_v13 = vpop.eup %2698 }
0x194c   :  { %v1525_v1 = vadd.f32 1.0, %v2699_v13  ;;  %v2701_v39 = vpop.eup %2700 }
0x194e   :  { %2702 = vrcp.f32 %v1525_v1 }
0x1958   :  { %v2703_v3 = vpop.eup %2702 }
0x1959   :  { %v1531_v15 = vsel %vm3125_vm13, %v2701_v39, %v2703_v3 }
0x195a   :  { %1538 = vrot.lane.b32.xlu0 %v1531_v15, %s2870_s7  ;;  %v1533_v30 = vmul.f32 0.0, %v1531_v15 }
0x19b1   :  { %v1537_v16 = vpop.permute.xlu1 %1536 }
0x19b2   :  { %v1542_v9 = vmul.f32 %v1537_v16, %v1530_v11 }
0x19b4   :  { %1546 = vrot.lane.b32.xlu1 %v1542_v9, %s2874_s4 }
0x19cc   :  { %v1539_v14 = vpop.permute.xlu0 %1538 }
0x19cd   :  { %v1543_v18 = vmul.f32 %v1539_v14, %v1531_v15 }
0x19cf   :  { %1548 = vrot.lane.b32.xlu0 %v1543_v18, %s2874_s4 }
0x1a26   :  { %v1547_v23 = vpop.permute.xlu1 %1546 }
0x1a27   :  { %v1552_v29 = vadd.f32 %v1547_v23, %v1532_v20 }
0x1a29   :  { %2704 = vtanh.f32 %v1552_v29 }
0x1a33   :  { %v2705_v41 = vpop.eup %2704 }
0x1a34   :  { %1558 = vrot.lane.b32.xlu1 %v2705_v41, %s2870_s7 }
0x1a41   :  { %v1549_v59 = vpop.permute.xlu0 %1548 }
0x1a42   :  { %v1553_v31 = vadd.f32 %v1549_v59, %v1533_v30 }
0x1a44   :  { %2706 = vtanh.f32 %v1553_v31 }
0x1a4e   :  { %v2707_v2 = vpop.eup %2706 }
0x1a4f   :  { %1560 = vrot.lane.b32.xlu0 %v2707_v2, %s2870_s7 }
0x1aa6   :  { %v1559_v12 = vpop.permute.xlu1 %1558 }
0x1aa7   :  { %v1564_v33 = vmul.f32 %v1559_v12, %v1530_v11 }
0x1ac1   :  { %v1561_v32 = vpop.permute.xlu0 %1560 }
0x1ac2   :  { %v1565_v35 = vmul.f32 %v1561_v32, %v1531_v15 }
0x1ac4   :  { %v1566_v36 = vpack.c.bf16 %v1565_v35, %v1564_v33 }
0x1ac6   :  { %1568 = vrot.lane.b32.xlu1 %v1566_v36, %s2874_s4 }
0x1b38   :  { %v1569_v38 = vpop.permute.xlu1 %1568 }
0x1b39   :  { %2447 = vmatmul.mubr.msk.bf16.vlgmr.msra.gmra.mrb[28].mxu0 %vm277_vm10, %v1569_v38 }
0x1b3a   :  { %1676 = vmatpush1.bf16.msra.mxu0 %v3326_v42  ;;  %1707 = vmatprep.mubr.bf16.mxu0 %v2872_v0 }
0x1b3b   :  { %1677 = vmatprep.subr.bf16.mxu0 %v3339_v44 }
0x1b3e   :  { %1678 = vmatpush1.bf16.msra.mxu0 %v3344_v54 }
0x1b3f   :  { %1777 = vmatprep.subr.bf16.mxu0 %v3321_v49 }
0x1c0c   :  { %v1607_v8 = vpop.f32.mrb[28].mxu0 }
0x1c0d   :  { %v1615_v60 = vadd.f32 %v1607_v8, %v3400_v34  ;;  %v1609_v58 = vpop.f32.mrb[29].mxu0 }
0x1c0e   :  { %v1610_v26 = vpop.f32.mrb[30].mxu0 }
0x1c0f   :  { %v2448_v6 = vmul.f32 -1.442695, %v1615_v60  ;;  %v1611_v47 = vpop.f32.mrb[31].mxu0 }
0x1c10   :  { %v1617_v48 = vadd.f32 %v1611_v47, %v1425_v10 }
0x1c11   :  { %2708 = vpow2.f32 %v2448_v6 }
0x1c12   :  { %v2449_v28 = vmul.f32 -1.442695, %v1617_v48 }
0x1c14   :  { %2710 = vpow2.f32 %v2449_v28 }
0x1c15   :  { %2712 = vtanh.f32 %v1615_v60 }
0x1c1b   :  { %v2709_v27 = vpop.eup %2708 }
0x1c1c   :  { %v1626_v25 = vadd.f32 1.0, %v2709_v27 }
0x1c1e   :  { %v2711_v43 = vpop.eup %2710  ;;  %2714 = vrcp.f32 %v1626_v25 }
0x1c1f   :  { %v1627_v55 = vadd.f32 1.0, %v2711_v43  ;;  %2716 = vtanh.f32 %v1617_v48  ;;  %v2713_v56 = vpop.eup %2712 }
0x1c21   :  { %2718 = vrcp.f32 %v1627_v55 }
0x1c28   :  { %v2715_v61 = vpop.eup %2714 }
0x1c29   :  { %v1632_v34 = vsel %vm3125_vm13, %v2713_v56, %v2715_v61  ;;  %v2717_v63 = vpop.eup %2716 }
0x1c2a   :  { %1638 = vrot.lane.b32.xlu0 %v1632_v34, %s2870_s7  ;;  %v1634_v13 = vmul.f32 %v1632_v34, %v1552_v29 }
0x1c2b   :  { %v2719_v10 = vpop.eup %2718 }
0x1c2c   :  { %v1633_v62 = vsel %vm3125_vm13, %v2717_v63, %v2719_v10 }
0x1c2d   :  { %1640 = vrot.lane.b32.xlu1 %v1633_v62, %s2870_s7  ;;  %v1635_v3 = vmul.f32 %v1633_v62, %v1553_v31 }
0x1c9c   :  { %v1639_v5 = vpop.permute.xlu0 %1638 }
0x1c9d   :  { %v1644_v7 = vmul.f32 %v1639_v5, %v1632_v34 }
0x1c9f   :  { %1648 = vrot.lane.b32.xlu0 %v1644_v7, %s2874_s4  ;;  %v1641_v11 = vpop.permute.xlu1 %1640 }
0x1ca0   :  { %v1645_v24 = vmul.f32 %v1641_v11, %v1633_v62 }
0x1ca2   :  { %1650 = vrot.lane.b32.xlu1 %v1645_v24, %s2874_s4 }
0x1d11   :  { %v1649_v1 = vpop.permute.xlu0 %1648 }
0x1d12   :  { %v1654_v39 = vadd.f32 %v1649_v1, %v1634_v13 }
0x1d14   :  { %2720 = vtanh.f32 %v1654_v39  ;;  %v1651_v15 = vpop.permute.xlu1 %1650 }
0x1d15   :  { %v1655_v16 = vadd.f32 %v1651_v15, %v1635_v3 }
0x1d17   :  { %2722 = vtanh.f32 %v1655_v16 }
0x1d1e   :  { %v2721_v9 = vpop.eup %2720 }
0x1d1f   :  { %1660 = vrot.lane.b32.xlu0 %v2721_v9, %s2870_s7 }
0x1d21   :  { %v2723_v14 = vpop.eup %2722 }
0x1d22   :  { %1662 = vrot.lane.b32.xlu1 %v2723_v14, %s2870_s7 }
0x1d91   :  { %v1661_v18 = vpop.permute.xlu0 %1660 }
0x1d92   :  { %v1666_v23 = vmul.f32 %v1661_v18, %v1632_v34 }
0x1d94   :  { %v1663_v20 = vpop.permute.xlu1 %1662 }
0x1d95   :  { %v1667_v41 = vmul.f32 %v1663_v20, %v1633_v62 }
0x1d97   :  { %v1668_v30 = vpack.c.bf16 %v1667_v41, %v1666_v23 }
0x1d99   :  { %1670 = vrot.lane.b32.xlu0 %v1668_v30, %s2874_s4 }
0x1e0b   :  { %v1671_v29 = vpop.permute.xlu0 %1670 }
0x1e0c   :  { %2450 = vmatmul.mubr.msk.bf16.vlgmr.msra.gmra.mrb[32].mxu0 %vm277_vm10, %v1671_v29 }
0x1e0d   :  { %1778 = vmatpush1.bf16.msra.mxu0 %v3326_v42  ;;  %1809 = vmatprep.mubr.bf16.mxu0 %v2872_v0 }
0x1e0e   :  { %1779 = vmatprep.subr.bf16.mxu0 %v3339_v44 }
0x1e11   :  { %1780 = vmatpush1.bf16.msra.mxu0 %v3344_v54 }
0x1e12   :  { %1879 = vmatprep.subr.bf16.mxu0 %v3321_v49 }
0x1edf   :  { %v1709_v59 = vpop.f32.mrb[32].mxu0 }
0x1ee0   :  { %v1717_v31 = vadd.f32 %v1709_v59, %v3404_v40  ;;  %v1711_v2 = vpop.f32.mrb[33].mxu0 }
0x1ee1   :  { %v1712_v12 = vpop.f32.mrb[34].mxu0 }
0x1ee2   :  { %v2451_v32 = vmul.f32 -1.442695, %v1717_v31  ;;  %v1713_v33 = vpop.f32.mrb[35].mxu0 }
0x1ee3   :  { %v1719_v35 = vadd.f32 %v1713_v33, %v3418_v53 }
0x1ee4   :  { %2724 = vpow2.f32 %v2451_v32 }
0x1ee5   :  { %v2452_v36 = vmul.f32 -1.442695, %v1719_v35 }
0x1ee7   :  { %2726 = vpow2.f32 %v2452_v36 }
0x1ee8   :  { %2728 = vtanh.f32 %v1717_v31 }
0x1eee   :  { %v2725_v38 = vpop.eup %2724 }
0x1eef   :  { %v1728_v8 = vadd.f32 1.0, %v2725_v38 }
0x1ef1   :  { %v2727_v60 = vpop.eup %2726  ;;  %2730 = vrcp.f32 %v1728_v8 }
0x1ef2   :  { %v1729_v58 = vadd.f32 1.0, %v2727_v60  ;;  %2732 = vtanh.f32 %v1719_v35  ;;  %v2729_v26 = vpop.eup %2728 }
0x1ef4   :  { %2734 = vrcp.f32 %v1729_v58 }
0x1efb   :  { %v2731_v6 = vpop.eup %2730 }
0x1efc   :  { %v1734_v40 = vsel %vm3125_vm13, %v2729_v26, %v2731_v6  ;;  %v2733_v47 = vpop.eup %2732 }
0x1efd   :  { %1740 = vrot.lane.b32.xlu1 %v1734_v40, %s2870_s7  ;;  %v1736_v55 = vmul.f32 %v1734_v40, %v1654_v39 }
0x1efe   :  { %v2735_v53 = vpop.eup %2734 }
0x1eff   :  { %v1735_v48 = vsel %vm3125_vm13, %v2733_v47, %v2735_v53 }
0x1f00   :  { %1742 = vrot.lane.b32.xlu0 %v1735_v48, %s2870_s7  ;;  %v1737_v34 = vmul.f32 %v1735_v48, %v1655_v16 }
0x1f6f   :  { %v1741_v28 = vpop.permute.xlu1 %1740 }
0x1f70   :  { %v1746_v27 = vmul.f32 %v1741_v28, %v1734_v40 }
0x1f72   :  { %1750 = vrot.lane.b32.xlu1 %v1746_v27, %s2874_s4  ;;  %v1743_v25 = vpop.permute.xlu0 %1742 }
0x1f73   :  { %v1747_v43 = vmul.f32 %v1743_v25, %v1735_v48 }
0x1f75   :  { %1752 = vrot.lane.b32.xlu0 %v1747_v43, %s2874_s4 }
0x1fe4   :  { %v1751_v56 = vpop.permute.xlu1 %1750 }
0x1fe5   :  { %v1756_v61 = vadd.f32 %v1751_v56, %v1736_v55 }
0x1fe7   :  { %2736 = vtanh.f32 %v1756_v61  ;;  %v1753_v63 = vpop.permute.xlu0 %1752 }
0x1fe8   :  { %v1757_v10 = vadd.f32 %v1753_v63, %v1737_v34 }
0x1fea   :  { %2738 = vtanh.f32 %v1757_v10 }
0x1ff1   :  { %v2737_v62 = vpop.eup %2736 }
0x1ff2   :  { %1762 = vrot.lane.b32.xlu1 %v2737_v62, %s2870_s7 }
0x1ff4   :  { %v2739_v5 = vpop.eup %2738 }
0x1ff5   :  { %1764 = vrot.lane.b32.xlu0 %v2739_v5, %s2870_s7 }
0x2064   :  { %v1763_v7 = vpop.permute.xlu1 %1762 }
0x2065   :  { %v1768_v24 = vmul.f32 %v1763_v7, %v1734_v40 }
0x2067   :  { %v1765_v11 = vpop.permute.xlu0 %1764 }
0x2068   :  { %v1769_v13 = vmul.f32 %v1765_v11, %v1735_v48 }
0x206a   :  { %v1770_v1 = vpack.c.bf16 %v1769_v13, %v1768_v24 }
0x206c   :  { %1772 = vrot.lane.b32.xlu1 %v1770_v1, %s2874_s4 }
0x20de   :  { %v1773_v39 = vpop.permute.xlu1 %1772 }
0x20df   :  { %2453 = vmatmul.mubr.msk.bf16.vlgmr.msra.gmra.mrb[36].mxu0 %vm277_vm10, %v1773_v39 }
0x20e0   :  { %1880 = vmatpush1.bf16.msra.mxu0 %v3326_v42  ;;  %1911 = vmatprep.mubr.bf16.mxu0 %v2872_v0 }
0x20e1   :  { %1881 = vmatprep.subr.bf16.mxu0 %v3339_v44 }
0x20e4   :  { %1882 = vmatpush1.bf16.msra.mxu0 %v3344_v54 }
0x20e5   :  { %2083 = vmatprep.subr.bf16.mxu0 %v3321_v49 }
0x21b2   :  { %v1811_v3 = vpop.f32.mrb[36].mxu0 }
0x21b3   :  { %v1819_v15 = vadd.f32 %v1811_v3, %v3408_v45  ;;  %v1813_v16 = vpop.f32.mrb[37].mxu0 }
0x21b4   :  { %v1814_v9 = vpop.f32.mrb[38].mxu0 }
0x21b5   :  { %v2454_v14 = vmul.f32 -1.442695, %v1819_v15  ;;  %v1815_v18 = vpop.f32.mrb[39].mxu0 }
0x21b6   :  { %v1821_v20 = vadd.f32 %v1815_v18, %v3414_v52 }
0x21b7   :  { %2740 = vpow2.f32 %v2454_v14 }
0x21b8   :  { %v2455_v23 = vmul.f32 -1.442695, %v1821_v20 }
0x21ba   :  { %2742 = vpow2.f32 %v2455_v23 }
0x21bb   :  { %2744 = vtanh.f32 %v1819_v15 }
0x21c1   :  { %v2741_v41 = vpop.eup %2740 }
0x21c2   :  { %v1830_v30 = vadd.f32 1.0, %v2741_v41 }
0x21c4   :  { %v2743_v29 = vpop.eup %2742  ;;  %2746 = vrcp.f32 %v1830_v30 }
0x21c5   :  { %v1831_v59 = vadd.f32 1.0, %v2743_v29  ;;  %2748 = vtanh.f32 %v1821_v20  ;;  %v2745_v49 = vpop.eup %2744 }
0x21c7   :  { %2750 = vrcp.f32 %v1831_v59 }
0x21ce   :  { %v2747_v31 = vpop.eup %2746 }
0x21cf   :  { %v1836_v45 = vsel %vm3125_vm13, %v2745_v49, %v2747_v31  ;;  %v2749_v2 = vpop.eup %2748 }
0x21d0   :  { %1842 = vrot.lane.b32.xlu0 %v1836_v45, %s2870_s7  ;;  %v1838_v38 = vmul.f32 %v1836_v45, %v1756_v61 }
0x21d1   :  { %v2751_v52 = vpop.eup %2750 }
0x21d2   :  { %v1837_v12 = vsel %vm3125_vm13, %v2749_v2, %v2751_v52 }
0x21d3   :  { %1844 = vrot.lane.b32.xlu1 %v1837_v12, %s2870_s7  ;;  %v1839_v58 = vmul.f32 %v1837_v12, %v1757_v10 }
0x2242   :  { %v1843_v32 = vpop.permute.xlu0 %1842 }
0x2243   :  { %v1848_v33 = vmul.f32 %v1843_v32, %v1836_v45 }
0x2245   :  { %1852 = vrot.lane.b32.xlu0 %v1848_v33, %s2874_s4  ;;  %v1845_v35 = vpop.permute.xlu1 %1844 }
0x2246   :  { %v1849_v36 = vmul.f32 %v1845_v35, %v1837_v12 }
0x2248   :  { %1854 = vrot.lane.b32.xlu1 %v1849_v36, %s2874_s4 }
0x22b7   :  { %v1853_v8 = vpop.permute.xlu0 %1852 }
0x22b8   :  { %v1858_v60 = vadd.f32 %v1853_v8, %v1838_v38 }
0x22ba   :  { %2752 = vtanh.f32 %v1858_v60  ;;  %v1855_v26 = vpop.permute.xlu1 %1854 }
0x22bb   :  { %v1859_v6 = vadd.f32 %v1855_v26, %v1839_v58 }
0x22bd   :  { %2754 = vtanh.f32 %v1859_v6 }
0x22c4   :  { %v2753_v40 = vpop.eup %2752 }
0x22c5   :  { %1864 = vrot.lane.b32.xlu0 %v2753_v40, %s2870_s7 }
0x22c7   :  { %v2755_v47 = vpop.eup %2754 }
0x22c8   :  { %1866 = vrot.lane.b32.xlu1 %v2755_v47, %s2870_s7 }
0x2337   :  { %v1865_v53 = vpop.permute.xlu0 %1864 }
0x2338   :  { %v1870_v28 = vmul.f32 %v1865_v53, %v1836_v45 }
0x233a   :  { %v1867_v48 = vpop.permute.xlu1 %1866 }
0x233b   :  { %v1871_v27 = vmul.f32 %v1867_v48, %v1837_v12 }
0x233d   :  { %v1872_v25 = vpack.c.bf16 %v1871_v27, %v1870_v28 }
0x233f   :  { %1874 = vrot.lane.b32.xlu0 %v1872_v25, %s2874_s4 }
0x23b1   :  { %v1875_v43 = vpop.permute.xlu0 %1874 }
0x23b2   :  { %2456 = vmatmul.mubr.msk.bf16.vlgmr.msra.gmra.mrb[40].mxu0 %vm277_vm10, %v1875_v43 }
0x23b3   :  { %2084 = vmatpush1.bf16.msra.mxu0 %v3326_v42  ;;  %2115 = vmatprep.mubr.bf16.mxu0 %v2872_v0 }
0x23b4   :  { %2085 = vmatprep.subr.bf16.mxu0 %v3339_v44 }
0x23b7   :  { %2086 = vmatpush1.bf16.msra.mxu0 %v3344_v54 }
0x23b8   :  { %2503 = vmatprep.subr.bf16.mxu0 %v2873_v22 }
0x2485   :  { %v1913_v55 = vpop.f32.mrb[40].mxu0 }
0x2486   :  { %v1921_v56 = vadd.f32 %v1913_v55, %v3412_v4  ;;  %v1915_v61 = vpop.f32.mrb[41].mxu0 }
0x2487   :  { %v1916_v34 = vpop.f32.mrb[42].mxu0 }
0x2488   :  { %v2457_v63 = vmul.f32 -1.442695, %v1921_v56  ;;  %v1917_v10 = vpop.f32.mrb[43].mxu0 }
0x2489   :  { %v1923_v62 = vadd.f32 %v1917_v10, %v3410_v46 }
0x248a   :  { %2756 = vpow2.f32 %v2457_v63 }
0x248b   :  { %v2458_v5 = vmul.f32 -1.442695, %v1923_v62 }
0x248d   :  { %2758 = vpow2.f32 %v2458_v5 }
0x248e   :  { %2760 = vtanh.f32 %v1921_v56 }
0x2494   :  { %v2757_v7 = vpop.eup %2756 }
0x2495   :  { %v1932_v11 = vadd.f32 1.0, %v2757_v7 }
0x2497   :  { %v2759_v24 = vpop.eup %2758  ;;  %2762 = vrcp.f32 %v1932_v11 }
0x2498   :  { %v1933_v13 = vadd.f32 1.0, %v2759_v24  ;;  %2764 = vtanh.f32 %v1923_v62  ;;  %v2761_v1 = vpop.eup %2760 }
0x249a   :  { %2766 = vrcp.f32 %v1933_v13 }
0x24a1   :  { %v2763_v39 = vpop.eup %2762 }
0x24a2   :  { %v1938_v4 = vsel %vm3125_vm13, %v2761_v1, %v2763_v39  ;;  %v2765_v3 = vpop.eup %2764 }
0x24a3   :  { %1944 = vrot.lane.b32.xlu1 %v1938_v4, %s2870_s7  ;;  %v1940_v20 = vmul.f32 %v1938_v4, %v1858_v60 }
0x24a4   :  { %v2767_v46 = vpop.eup %2766 }
0x24a5   :  { %v1939_v15 = vsel %vm3125_vm13, %v2765_v3, %v2767_v46 }
0x24a6   :  { %1946 = vrot.lane.b32.xlu0 %v1939_v15, %s2870_s7  ;;  %v1941_v30 = vmul.f32 %v1939_v15, %v1859_v6 }
0x2515   :  { %v1945_v16 = vpop.permute.xlu1 %1944 }
0x2516   :  { %v1950_v9 = vmul.f32 %v1945_v16, %v1938_v4 }
0x2518   :  { %1954 = vrot.lane.b32.xlu1 %v1950_v9, %s2874_s4  ;;  %v1947_v14 = vpop.permute.xlu0 %1946 }
0x2519   :  { %v1951_v18 = vmul.f32 %v1947_v14, %v1939_v15 }
0x251b   :  { %1956 = vrot.lane.b32.xlu0 %v1951_v18, %s2874_s4 }
0x258a   :  { %v1955_v23 = vpop.permute.xlu1 %1954 }
0x258b   :  { %v1960_v41 = vadd.f32 %v1955_v23, %v1940_v20 }
0x258d   :  { %2768 = vtanh.f32 %v1960_v41  ;;  %v1957_v29 = vpop.permute.xlu0 %1956 }
0x258e   :  { %v1961_v59 = vadd.f32 %v1957_v29, %v1941_v30 }
0x2590   :  { %2770 = vtanh.f32 %v1961_v59 }
0x2597   :  { %v2769_v49 = vpop.eup %2768 }
0x2598   :  { %1966 = vrot.lane.b32.xlu1 %v2769_v49, %s2870_s7 }
0x259a   :  { %v2771_v31 = vpop.eup %2770 }
0x259b   :  { %1968 = vrot.lane.b32.xlu0 %v2771_v31, %s2870_s7 }
0x260a   :  { %v1967_v45 = vpop.permute.xlu1 %1966 }
0x260b   :  { %v1972_v52 = vmul.f32 %v1967_v45, %v1938_v4 }
0x260d   :  { %v1969_v2 = vpop.permute.xlu0 %1968 }
0x260e   :  { %v1973_v12 = vmul.f32 %v1969_v2, %v1939_v15 }
0x2610   :  { %v1974_v32 = vpack.c.bf16 %v1973_v12, %v1972_v52 }
0x2612   :  { %1976 = vrot.lane.b32.xlu1 %v1974_v32, %s2874_s4 }
0x2684   :  { %v1977_v33 = vpop.permute.xlu1 %1976 }
0x2685   :  { %2459 = vmatmul.mubr.msk.bf16.vlgmr.msra.gmra.mrb[48].mxu1 %vm277_vm10, %v1977_v33 }
0x2686   :  { %2186 = vmatpush1.bf16.msra.mxu1 %v3326_v42  ;;  %2217 = vmatprep.mubr.bf16.mxu1 %v2872_v0 }
0x2687   :  { %2187 = vmatprep.subr.bf16.mxu1 %v3339_v44 }
0x268a   :  { %2188 = vmatpush1.bf16.msra.mxu1 %v3344_v54 }
0x2758   :  { %v2015_v35 = vpop.f32.mrb[48].mxu1 }
0x2759   :  { %v2023_v36 = vadd.f32 %v2015_v35, %v3416_v51  ;;  %v2017_v38 = vpop.f32.mrb[49].mxu1 }
0x275a   :  { %v2018_v8 = vpop.f32.mrb[50].mxu1 }
0x275b   :  { %v2460_v60 = vmul.f32 -1.442695, %v2023_v36  ;;  %v2019_v58 = vpop.f32.mrb[51].mxu1 }
0x275c   :  { %v2025_v26 = vadd.f32 %v2019_v58, %v3406_v57 }
0x275d   :  { %2772 = vpow2.f32 %v2460_v60 }
0x275e   :  { %v2461_v6 = vmul.f32 -1.442695, %v2025_v26 }
0x2760   :  { %2774 = vpow2.f32 %v2461_v6 }
0x2761   :  { %2776 = vtanh.f32 %v2023_v36 }
0x2767   :  { %v2773_v40 = vpop.eup %2772 }
0x2768   :  { %v2034_v42 = vadd.f32 1.0, %v2773_v40 }
0x276a   :  { %v2775_v0 = vpop.eup %2774  ;;  %2778 = vrcp.f32 %v2034_v42 }
0x276b   :  { %v2035_v44 = vadd.f32 1.0, %v2775_v0  ;;  %2780 = vtanh.f32 %v2025_v26  ;;  %v2777_v54 = vpop.eup %2776 }
0x276d   :  { %2782 = vrcp.f32 %v2035_v44 }
0x2774   :  { %v2779_v47 = vpop.eup %2778 }
0x2775   :  { %v2040_v51 = vsel %vm3125_vm13, %v2777_v54, %v2779_v47  ;;  %v2781_v53 = vpop.eup %2780 }
0x2776   :  { %2046 = vrot.lane.b32.xlu0 %v2040_v51, %s2870_s7  ;;  %v2042_v55 = vmul.f32 %v2040_v51, %v1960_v41 }
0x2777   :  { %v2783_v57 = vpop.eup %2782 }
0x2778   :  { %v2041_v48 = vsel %vm3125_vm13, %v2781_v53, %v2783_v57 }
0x2779   :  { %2048 = vrot.lane.b32.xlu1 %v2041_v48, %s2870_s7  ;;  %v2043_v34 = vmul.f32 %v2041_v48, %v1961_v59 }
0x27e8   :  { %v2047_v28 = vpop.permute.xlu0 %2046 }
0x27e9   :  { %v2052_v27 = vmul.f32 %v2047_v28, %v2040_v51 }
0x27eb   :  { %2056 = vrot.lane.b32.xlu0 %v2052_v27, %s2874_s4  ;;  %v2049_v25 = vpop.permute.xlu1 %2048 }
0x27ec   :  { %v2053_v43 = vmul.f32 %v2049_v25, %v2041_v48 }
0x27ee   :  { %2058 = vrot.lane.b32.xlu1 %v2053_v43, %s2874_s4 }
0x285d   :  { %v2057_v56 = vpop.permute.xlu0 %2056 }
0x285e   :  { %v2062_v61 = vadd.f32 %v2057_v56, %v2042_v55 }
0x2860   :  { %2784 = vtanh.f32 %v2062_v61  ;;  %v2059_v63 = vpop.permute.xlu1 %2058 }
0x2861   :  { %v2063_v10 = vadd.f32 %v2059_v63, %v2043_v34 }
0x2863   :  { %2786 = vtanh.f32 %v2063_v10 }
0x286a   :  { %v2785_v62 = vpop.eup %2784 }
0x286b   :  { %2068 = vrot.lane.b32.xlu0 %v2785_v62, %s2870_s7 }
0x286d   :  { %v2787_v5 = vpop.eup %2786 }
0x286e   :  { %2070 = vrot.lane.b32.xlu1 %v2787_v5, %s2870_s7 }
0x28dd   :  { %v2069_v7 = vpop.permute.xlu0 %2068 }
0x28de   :  { %v2074_v24 = vmul.f32 %v2069_v7, %v2040_v51 }
0x28e0   :  { %v2071_v11 = vpop.permute.xlu1 %2070 }
0x28e1   :  { %v2075_v13 = vmul.f32 %v2071_v11, %v2041_v48 }
0x28e3   :  { %v2076_v1 = vpack.c.bf16 %v2075_v13, %v2074_v24 }
0x28e5   :  { %2078 = vrot.lane.b32.xlu0 %v2076_v1, %s2874_s4 }
0x2957   :  { %v2079_v39 = vpop.permute.xlu0 %2078 }
0x2958   :  { %2462 = vmatmul.mubr.msk.bf16.vlgmr.msra.gmra.mrb[44].mxu0 %vm277_vm10, %v2079_v39 }
0x2959   :  { %2504 = vmatpush3.bf16.msra.mxu0 %v2560_v50  ;;  %2511 = vmatprep.mubr.msk.bf16.mxu0 %vm2875_vm3, %v2873_v22 }
0x295a   :  { %2505 = vmatprep.subr.bf16.mxu0 %v2873_v22 }
0x2a2b   :  { %v2117_v4 = vpop.f32.mrb[44].mxu0 }
0x2a2c   :  { %v2125_v3 = vadd.f32 %v2117_v4, %v3420_v21  ;;  %v2119_v46 = vpop.f32.mrb[45].mxu0 }
0x2a2d   :  { %v2120_v15 = vpop.f32.mrb[46].mxu0  ;;  %v2561_v46 = vld [vmem:[#allocation6 + $0x8] sm:$0xff]  }
0x2a2e   :  { %v2463_v16 = vmul.f32 -1.442695, %v2125_v3  ;;  %v2121_v9 = vpop.f32.mrb[47].mxu0  ;;  %2506 = vmatpush3.bf16.msra.mxu0 %v2561_v46 }
0x2a2f   :  { %v2127_v14 = vadd.f32 %v2121_v9, %v3402_v37  ;;  %v2562_v9 = vld [vmem:[#allocation6 + $0x10] sm:$0xff]   ;;  %2507 = vmatprep.subr.bf16.mxu0 %v2873_v22 }
0x2a30   :  { %2788 = vpow2.f32 %v2463_v16 }
0x2a31   :  { %v2464_v18 = vmul.f32 -1.442695, %v2127_v14 }
0x2a32   :  { %2508 = vmatpush3.bf16.msra.mxu0 %v2562_v9 }
0x2a33   :  { %2790 = vpow2.f32 %v2464_v18  ;;  %2509 = vmatprep.subr.bf16.mxu0 %v2873_v22  ;;  %v2468_v22 = vld [vmem:[%s3578_s9] ss:$0 sm:$0xff] }
0x2a34   :  { %2792 = vtanh.f32 %v2125_v3 }
0x2a3a   :  { %v2789_v20 = vpop.eup %2788 }
0x2a3b   :  { %v2136_v23 = vadd.f32 1.0, %v2789_v20 }
0x2a3d   :  { %v2791_v41 = vpop.eup %2790  ;;  %2794 = vrcp.f32 %v2136_v23 }
0x2a3e   :  { %v2137_v30 = vadd.f32 1.0, %v2791_v41  ;;  %2796 = vtanh.f32 %v2127_v14  ;;  %v2793_v29 = vpop.eup %2792  ;;  %v2563_v14 = vld [vmem:[#allocation6 + $0x18] sm:$0xff]  }
0x2a3f   :  { %2510 = vmatpush3.bf16.msra.mxu0 %v2563_v14 }
0x2a40   :  { %2798 = vrcp.f32 %v2137_v30 }
0x2a47   :  { %v2795_v59 = vpop.eup %2794 }
0x2a48   :  { %v2142_v21 = vsel %vm3125_vm13, %v2793_v29, %v2795_v59  ;;  %v2797_v49 = vpop.eup %2796 }
0x2a49   :  { %2148 = vrot.lane.b32.xlu1 %v2142_v21, %s2870_s7  ;;  %v2144_v32 = vmul.f32 %v2142_v21, %v2062_v61 }
0x2a4a   :  { %v2799_v37 = vpop.eup %2798 }
0x2a4b   :  { %v2143_v31 = vsel %vm3125_vm13, %v2797_v49, %v2799_v37 }
0x2a4c   :  { %2150 = vrot.lane.b32.xlu0 %v2143_v31, %s2870_s7  ;;  %v2145_v36 = vmul.f32 %v2143_v31, %v2063_v10 }
0x2abb   :  { %v2149_v45 = vpop.permute.xlu1 %2148 }
0x2abc   :  { %v2154_v2 = vmul.f32 %v2149_v45, %v2142_v21 }
0x2abe   :  { %v2151_v52 = vpop.permute.xlu0 %2150  ;;  %2158 = vrot.lane.b32.xlu1 %v2154_v2, %s2874_s4 }
0x2abf   :  { %v2155_v12 = vmul.f32 %v2151_v52, %v2143_v31 }
0x2ac1   :  { %2160 = vrot.lane.b32.xlu0 %v2155_v12, %s2874_s4 }
0x2b30   :  { %v2159_v33 = vpop.permute.xlu1 %2158 }
0x2b31   :  { %v2164_v35 = vadd.f32 %v2159_v33, %v2144_v32 }
0x2b33   :  { %2800 = vtanh.f32 %v2164_v35  ;;  %v2161_v38 = vpop.permute.xlu0 %2160 }
0x2b34   :  { %v2165_v8 = vadd.f32 %v2161_v38, %v2145_v36 }
0x2b36   :  { %2802 = vtanh.f32 %v2165_v8 }
0x2b3d   :  { %v2801_v60 = vpop.eup %2800 }
0x2b3e   :  { %2170 = vrot.lane.b32.xlu1 %v2801_v60, %s2870_s7 }
0x2b40   :  { %v2803_v58 = vpop.eup %2802 }
0x2b41   :  { %2172 = vrot.lane.b32.xlu0 %v2803_v58, %s2870_s7 }
0x2bb0   :  { %v2171_v26 = vpop.permute.xlu1 %2170 }
0x2bb1   :  { %v2176_v40 = vmul.f32 %v2171_v26, %v2142_v21 }
0x2bb3   :  { %v2173_v6 = vpop.permute.xlu0 %2172 }
0x2bb4   :  { %v2177_v42 = vmul.f32 %v2173_v6, %v2143_v31 }
0x2bb6   :  { %v2178_v0 = vpack.c.bf16 %v2177_v42, %v2176_v40 }
0x2bb8   :  { %2180 = vrot.lane.b32.xlu1 %v2178_v0, %s2874_s4 }
0x2c2a   :  { %v2181_v44 = vpop.permute.xlu1 %2180 }
0x2c2b   :  { %2465 = vmatmul.mubr.msk.bf16.vlgmr.msra.gmra.mrb[52].mxu1 %vm277_vm10, %v2181_v44 }
0x2cfe   :  { %v2219_v54 = vpop.f32.mrb[52].mxu1 }
0x2cff   :  { %v2227_v47 = vadd.f32 %v2219_v54, %v3422_v17  ;;  %v2221_v51 = vpop.f32.mrb[53].mxu1 }
0x2d00   :  { %v2222_v53 = vpop.f32.mrb[54].mxu1 }
0x2d01   :  { %v2466_v57 = vmul.f32 -1.442695, %v2227_v47  ;;  %v2223_v48 = vpop.f32.mrb[55].mxu1 }
0x2d02   :  { %v2229_v28 = vadd.f32 %v2223_v48, %v3398_v19 }
0x2d03   :  { %2804 = vpow2.f32 %v2466_v57 }
0x2d04   :  { %v2467_v27 = vmul.f32 -1.442695, %v2229_v28 }
0x2d06   :  { %2806 = vpow2.f32 %v2467_v27 }
0x2d07   :  { %2808 = vtanh.f32 %v2227_v47 }
0x2d0d   :  { %v2805_v25 = vpop.eup %2804 }
0x2d0e   :  { %v2238_v43 = vadd.f32 1.0, %v2805_v25 }
0x2d10   :  { %v2807_v55 = vpop.eup %2806  ;;  %2810 = vrcp.f32 %v2238_v43 }
0x2d11   :  { %v2239_v56 = vadd.f32 1.0, %v2807_v55  ;;  %2812 = vtanh.f32 %v2229_v28  ;;  %v2809_v61 = vpop.eup %2808 }
0x2d13   :  { %2814 = vrcp.f32 %v2239_v56 }
0x2d1a   :  { %v2811_v34 = vpop.eup %2810 }
0x2d1b   :  { %v2244_v17 = vsel %vm3125_vm13, %v2809_v61, %v2811_v34  ;;  %v2813_v63 = vpop.eup %2812 }
0x2d1c   :  { %2250 = vrot.lane.b32.xlu0 %v2244_v17, %s2870_s7  ;;  %v2246_v24 = vmul.f32 %v2244_v17, %v2164_v35 }
0x2d1d   :  { %v2815_v19 = vpop.eup %2814 }
0x2d1e   :  { %v2245_v10 = vsel %vm3125_vm13, %v2813_v63, %v2815_v19 }
0x2d1f   :  { %2252 = vrot.lane.b32.xlu1 %v2245_v10, %s2870_s7  ;;  %v2247_v39 = vmul.f32 %v2245_v10, %v2165_v8 }
0x2d8e   :  { %v2251_v62 = vpop.permute.xlu0 %2250 }
0x2d8f   :  { %v2256_v5 = vmul.f32 %v2251_v62, %v2244_v17 }
0x2d91   :  { %2260 = vrot.lane.b32.xlu0 %v2256_v5, %s2874_s4  ;;  %v2253_v7 = vpop.permute.xlu1 %2252 }
0x2d92   :  { %v2257_v11 = vmul.f32 %v2253_v7, %v2245_v10 }
0x2d94   :  { %2262 = vrot.lane.b32.xlu1 %v2257_v11, %s2874_s4 }
0x2e03   :  { %v2261_v13 = vpop.permute.xlu0 %2260 }
0x2e04   :  { %v2266_v1 = vadd.f32 %v2261_v13, %v2246_v24 }
0x2e06   :  { %2816 = vtanh.f32 %v2266_v1  ;;  %v2263_v4 = vpop.permute.xlu1 %2262 }
0x2e07   :  { %v2267_v3 = vadd.f32 %v2263_v4, %v2247_v39 }
0x2e09   :  { %2818 = vtanh.f32 %v2267_v3 }
0x2e10   :  { %v2817_v15 = vpop.eup %2816 }
0x2e11   :  { %2272 = vrot.lane.b32.xlu0 %v2817_v15, %s2870_s7 }
0x2e13   :  { %v2819_v16 = vpop.eup %2818 }
0x2e14   :  { %2274 = vrot.lane.b32.xlu1 %v2819_v16, %s2870_s7 }
0x2e83   :  { %v2273_v18 = vpop.permute.xlu0 %2272 }
0x2e84   :  { %v2278_v23 = vmul.f32 %v2273_v18, %v2244_v17 }
0x2e86   :  { %v2275_v20 = vpop.permute.xlu1 %2274 }
0x2e87   :  { %v2279_v41 = vmul.f32 %v2275_v20, %v2245_v10 }
0x2e89   :  { %v2280_v30 = vpack.c.bf16 %v2279_v41, %v2278_v23 }
0x2e8b   :  { %2282 = vrot.lane.b32.xlu0 %v2280_v30, %s2874_s4  ;;  %v2284_v29 = vrot.slane %v2280_v30, 4 }
0x2e8d   :  { %2285 = vrot.lane.b32.xlu1 %v2284_v29, %s2870_s7 }
0x2efd   :  { %v2283_v59 = vpop.permute.xlu0 %2282 }
0x2eff   :  { %v2286_v21 = vpop.permute.xlu1 %2285 }
0x2f00   :  { %v2289_v49 = vsel %vm277_vm10, %v2283_v59, %v2286_v21 }
0x2f01   :  { %2512 = vmatmul.mubr.msk.bf16.vlgmr.msra.gmra.mrb[48].mxu0 %vm1345_vm2, %v2289_v49 }
0x2fd4   :  { %v2365_v37 = vpop.f32.mrb[48].mxu0 }
0x2fd5   :  { %v2366_v31 = vadd.f32 %v2468_v22, %v2365_v37  ;;  %v2513_v45 = vpop.f32.mrb[49].mxu0 }
0x2fd6   :  { %v2368_v2 = vpop.f32.mrb[50].mxu0 }
0x2fd7   :  { %2371 = vst [vmem:[%s3579_s10] sm:$0xff] %v2366_v31  ;;  %v2514_v52 = vpop.f32.mrb[51].mxu0 }
0x2fd8   :  { %2376 = vsyncpa [#allocation5], 1 }
0x2fd9   :  { %2377 = vsyncpa [#allocation7], 1 }

</bundles_post_ra>
